<compile_context>
chip_gen: v7x
topology: tpu7x:2x2x1
jax: 0.10.0
libtpu: 0.0.40
codegen_flags: <defaults>
</compile_context>

<pallas_src>
import jax
import jax.numpy as jnp
from jax.experimental import pallas as pl
from jax.experimental.pallas import tpu as pltpu


# ---------------------------------------------------------------------------
# elementwise helpers (shared by kernels and the pure-JAX reference)
# ---------------------------------------------------------------------------
def _h_sigmoid(x):
    return jnp.clip(x + 3.0, 0.0, 6.0) * (1.0 / 6.0)       # ReLU6(x + 3) / 6


def _h_swish(x):
    return x * _h_sigmoid(x)


def _relu(x):
    return jnp.maximum(x, 0.0)


_ACTS = {"hswish": _h_swish, "relu": _relu}


def _make_divisible(v, divisor, min_value=None):
    if min_value is None:
        min_value = divisor
    new_v = max(min_value, int(v + divisor / 2) // divisor * divisor)
    if new_v < 0.9 * v:
        new_v += divisor
    return new_v


# ---------------------------------------------------------------------------
# fused InvertedResidual kernel (one grid step = one image of the batch)
#   [expand 1x1 (+BN) act] -> depthwise kxk stride s (+BN) [act] -> [SE]
#   -> project 1x1 (+BN) [-> +x]
# ---------------------------------------------------------------------------
def make_block_kernel(*, kernel_size, stride, has_expand, use_se, add_residual,
                      act_name, matmul_dtype=jnp.float32):
    k, s = kernel_size, stride
    p = (k - 1) // 2
    act = _ACTS[act_name]
    cast_act = matmul_dtype != jnp.float32       # weights are pre-cast host-side

    def mm(a, w):
        if cast_act:
            a = a.astype(matmul_dtype)
        return jnp.dot(a, w, preferred_element_type=jnp.float32)

    def kernel(*refs):
        # refs = (x_ref, *weight_refs, o_ref, pad_ref)
        x_ref, o_ref, pad_ref = refs[0], refs[-2], refs[-1]
        wi = iter(refs[1:-2])

        _, H, W, Cin = x_ref.shape
        Hp, Wp, Chid = pad_ref.shape
        Ho = (H + 2 * p - k) // s + 1
        Wo = (W + 2 * p - k) // s + 1

        x3 = x_ref[0]                                        # (H, W, Cin)

        # ---- expansion 1x1 conv (+ folded BN) + activation ----------------
        if has_expand:
            w1 = next(wi)[...]                               # (Cin, Chid)
            b1 = next(wi)[...]                               # (1,  Chid) f32
            h3 = act(mm(x3.reshape(H * W, Cin), w1) + b1).reshape(H, W, Chid)
        else:
            h3 = x3                                          # Cin == Chid

        # ---- depthwise kxk conv, stride s (+ folded BN) --------------------
        wdw = next(wi)[...]                                  # (k*k, Chid)
        bdw = next(wi)[...]                                  # (1,   Chid)

        # Zero only the p-wide halo border; the interior is fully rewritten
        # every grid step, so iterations stay independent ("parallel" safe).
        if p > 0:
            pad_ref[0:p, :, :] = jnp.zeros((p, Wp, Chid), pad_ref.dtype)
            pad_ref[p + H:Hp, :, :] = jnp.zeros((Hp - p - H, Wp, Chid),
                                                pad_ref.dtype)
            pad_ref[:, 0:p, :] = jnp.zeros((Hp, p, Chid), pad_ref.dtype)
            pad_ref[:, p + W:Wp, :] = jnp.zeros((Hp, Wp - p - W, Chid),
                                                pad_ref.dtype)
        if h3.dtype != pad_ref.dtype:
            h3 = h3.astype(pad_ref.dtype)
        pad_ref[p:p + H, p:p + W, :] = h3

        # Static k*k tap unroll; accumulator starts from the first tap.
        # For stride > 1 the subsample happens here via strided VMEM reads,
        # so no full-resolution intermediate ever leaves the kernel.
        acc = None
        for dy in range(k):
            for dx in range(k):
                if s == 1:
                    tap = pad_ref[dy:dy + Ho, dx:dx + Wo, :]
                else:
                    tap = pad_ref[pl.ds(dy, Ho, stride=s),
                                  pl.ds(dx, Wo, stride=s), :]
                t = tap * wdw[dy * k + dx]
                acc = t if acc is None else acc + t
        acc = acc + bdw
        if not has_expand:            # PyTorch applies the activation after the
            acc = act(acc)            # depthwise conv only in the no-expand path

        # ---- Squeeze-Excite + 1x1 projection (+ folded BN) + residual ------
        a2 = acc.reshape(Ho * Wo, Chid)
        if use_se:
            wse1 = next(wi)[...]; bse1 = next(wi)[...]
            wse2 = next(wi)[...]; bse2 = next(wi)[...]
            z = jnp.mean(a2, axis=0, keepdims=True)          # global avg pool
            z = _relu(mm(z, wse1) + bse1)
            z = _h_sigmoid(mm(z, wse2) + bse2)
            a2 = a2 * z                                      # channel gate

        w2 = next(wi)[...]                                   # (Chid, Cout)
        b2 = next(wi)[...]                                   # (1,    Cout)
        y2 = mm(a2, w2) + b2
        if add_residual:                                     # stride 1, Cin==Cout
            y2 = y2 + x3.reshape(H * W, Cin)
        y3 = y2.reshape(Ho, Wo, y2.shape[-1])
        if y3.dtype != o_ref.dtype:
            y3 = y3.astype(o_ref.dtype)
        o_ref[0] = y3

    return kernel


# ---------------------------------------------------------------------------
# host wrappers
# ---------------------------------------------------------------------------
def _rep_spec(a):
    nd = a.ndim
    return pl.BlockSpec(a.shape, lambda i, _nd=nd: (0,) * _nd)


def inverted_residual_nhwc(x, fp, cfg, *, matmul_dtype=jnp.float32):
    """Fused InvertedResidual forward, NHWC in / NHWC out, one pallas_call."""
    in_c, hid, out_c = cfg["in_channel"], cfg["hidden_dim"], cfg["out_channel"]
    k, s = cfg["kernel_size"], cfg["stride"]
    use_se, use_hs = cfg["use_se"], cfg["use_hs"]
    has_expand = in_c != hid
    identity = (s == 1) and (in_c == out_c)
    act_name = "hswish" if use_hs else "relu"

    B, H, W, C = x.shape
    assert C == in_c
    p = (k - 1) // 2
    Ho = (H + 2 * p - k) // s + 1
    Wo = (W + 2 * p - k) // s + 1
    Hp, Wp = H + 2 * p, W + 2 * p

    cast = (lambda a: a.astype(matmul_dtype)) if matmul_dtype != jnp.float32 \
        else (lambda a: a)
    weights = []
    if has_expand:
        weights += [cast(fp["w1"]), fp["b1"]]
    weights += [fp["wdw"], fp["bdw"]]
    if use_se:
        weights += [cast(fp["wse1"]), fp["bse1"], cast(fp["wse2"]), fp["bse2"]]
    weights += [cast(fp["w2"]), fp["b2"]]

    kernel = make_block_kernel(kernel_size=k, stride=s, has_expand=has_expand,
                               use_se=use_se, add_residual=identity,
                               act_name=act_name, matmul_dtype=matmul_dtype)

    flops = 2 * Ho * Wo * k * k * hid + 2 * Ho * Wo * hid * out_c
    if has_expand:
        flops += 2 * H * W * in_c * hid
    if use_se:
        flops += 4 * hid * int(fp["wse1"].shape[1])
    flops *= B
    bytes_accessed = (int(x.size) * x.dtype.itemsize
                      + B * Ho * Wo * out_c * 4
                      + sum(int(w.size) * w.dtype.itemsize for w in weights))

    y = pl.pallas_call(
        kernel,
        out_shape=jax.ShapeDtypeStruct((B, Ho, Wo, out_c), jnp.float32),
        grid=(B,),
        in_specs=[pl.BlockSpec((1, H, W, in_c), lambda i: (i, 0, 0, 0))]
                 + [_rep_spec(a) for a in weights],
        out_specs=pl.BlockSpec((1, Ho, Wo, out_c), lambda i: (i, 0, 0, 0)),
        scratch_shapes=[pltpu.VMEM((Hp, Wp, hid), jnp.float32)],
        compiler_params=pltpu.CompilerParams(
            dimension_semantics=("parallel",),
            vmem_limit_bytes=48 * 1024 * 1024),
        cost_estimate=pl.CostEstimate(flops=int(flops), transcendentals=0,
                                      bytes_accessed=int(bytes_accessed)),
    )(x, *weights)
    return y


def inverted_residual(x_nchw, fp, cfg, *, matmul_dtype=jnp.float32):
    # NCHW convenience wrapper (matches the PyTorch interface).  For a stack of
    # blocks, call inverted_residual_nhwc directly and keep activations NHWC so
    # the layout transposes happen once at the network boundary, not per block.
    x = jnp.transpose(x_nchw, (0, 2, 3, 1))
    y = inverted_residual_nhwc(x, fp, cfg, matmul_dtype=matmul_dtype)
    return jnp.transpose(y, (0, 3, 1, 2))


# ---------------------------------------------------------------------------
# parameter init (deterministic) with eval-mode BatchNorm folded into convs
# ---------------------------------------------------------------------------
def _fold_bn(gamma, beta, mean, var, eps=1e-5):
    scale = gamma / jnp.sqrt(var + eps)
    return scale, beta - mean * scale


def init_params(key, cfg):
    in_c, hid, out_c, k = (cfg["in_channel"], cfg["hidden_dim"],
                           cfg["out_channel"], cfg["kernel_size"])
    has_expand = in_c != hid
    red = _make_divisible(hid // 4, 8)

    keys = iter(jax.random.split(key, 32))
    nrm = lambda shape, s=0.1: s * jax.random.normal(next(keys), shape, jnp.float32)

    def bn(c):
        g = 1.0 + 0.1 * jax.random.normal(next(keys), (c,), jnp.float32)
        b = 0.1 * jax.random.normal(next(keys), (c,), jnp.float32)
        m = 0.1 * jax.random.normal(next(keys), (c,), jnp.float32)
        v = 0.5 + jax.random.uniform(next(keys), (c,), jnp.float32)
        return g, b, m, v

    fp = {}
    if has_expand:
        w1 = nrm((in_c, hid))                                # 1x1 expand (in, out)
        s1, b1 = _fold_bn(*bn(hid))
        fp["w1"], fp["b1"] = w1 * s1[None, :], b1[None, :]
    wdw = nrm((k * k, hid))                                  # depthwise taps (k*k, C)
    s2, b2 = _fold_bn(*bn(hid))
    fp["wdw"], fp["bdw"] = wdw * s2[None, :], b2[None, :]
    if cfg["use_se"]:
        fp["wse1"], fp["bse1"] = nrm((hid, red)), nrm((1, red))
        fp["wse2"], fp["bse2"] = nrm((red, hid)), nrm((1, hid))
    w2 = nrm((hid, out_c))                                   # 1x1 project (in, out)
    s3, b3 = _fold_bn(*bn(out_c))
    fp["w2"], fp["b2"] = w2 * s3[None, :], b3[None, :]
    return fp


# ---------------------------------------------------------------------------
# pure-JAX reference (same folded params) for correctness checking
# ---------------------------------------------------------------------------
def ref_inverted_residual(x_nchw, fp, cfg):
    in_c, hid, out_c = cfg["in_channel"], cfg["hidden_dim"], cfg["out_channel"]
    k, s = cfg["kernel_size"], cfg["stride"]
    use_se, use_hs = cfg["use_se"], cfg["use_hs"]
    has_expand = in_c != hid
    identity = (s == 1) and (in_c == out_c)
    act = _h_swish if use_hs else _relu

    B, _, H, W = x_nchw.shape
    p = (k - 1) // 2
    Ho1, Wo1 = H + 2 * p - k + 1, W + 2 * p - k + 1
    x = jnp.transpose(x_nchw, (0, 2, 3, 1)).astype(jnp.float32)

    h = x
    if has_expand:
        h = act(jnp.einsum("bhwc,cd->bhwd", h, fp["w1"]) + fp["b1"])
    hp = jnp.pad(h, ((0, 0), (p, p), (p, p), (0, 0)))
    acc = jnp.zeros((B, Ho1, Wo1, hid), jnp.float32)
    for dy in range(k):
        for dx in range(k):
            acc = acc + hp[:, dy:dy + Ho1, dx:dx + Wo1, :] * fp["wdw"][dy * k + dx]
    acc = acc + fp["bdw"]
    acc = acc[:, ::s, ::s, :]
    if not has_expand:
        acc = act(acc)
    if use_se:
        z = jnp.mean(acc, axis=(1, 2))
        z = _relu(z @ fp["wse1"] + fp["bse1"])
        z = _h_sigmoid(z @ fp["wse2"] + fp["bse2"])
        acc = acc * z[:, None, None, :]
    y = jnp.einsum("bhwc,cd->bhwd", acc, fp["w2"]) + fp["b2"]
    if identity:
        y = y + x
    return jnp.transpose(y, (0, 3, 1, 2))


# ---------------------------------------------------------------------------
if __name__ == "__main__":
    key = jax.random.PRNGKey(0)
    k_p1, k_p2, k_x1, k_x2 = jax.random.split(key, 4)

    # Config 1: expansion path, SE + h-swish, stride 1 -> residual identity.
    cfg1 = dict(in_channel=32, hidden_dim=128, out_channel=32,
                kernel_size=3, stride=1, use_se=True, use_hs=True)
    p1 = init_params(k_p1, cfg1)
    x1 = jax.random.normal(k_x1, (2, 32, 16, 16), jnp.float32)
    y1 = jax.block_until_ready(inverted_residual(x1, p1, cfg1))
    r1 = ref_inverted_residual(x1, p1, cfg1)
    assert y1.shape == (2, 32, 16, 16), y1.shape
    assert bool(jnp.all(jnp.isfinite(y1)))
    assert bool(jnp.allclose(y1, r1, atol=2e-3, rtol=2e-3)), \
        float(jnp.max(jnp.abs(y1 - r1)))

    # Config 2: no-expansion path (in == hidden), ReLU, no SE, stride 2 --
    # fully fused including the in-kernel strided subsample.
    cfg2 = dict(in_channel=32, hidden_dim=32, out_channel=40,
                kernel_size=3, stride=2, use_se=False, use_hs=False)
    p2 = init_params(k_p2, cfg2)
    x2 = jax.random.normal(k_x2, (2, 32, 16, 16), jnp.float32)
    y2 = jax.block_until_ready(inverted_residual(x2, p2, cfg2))
    r2 = ref_inverted_residual(x2, p2, cfg2)
    assert y2.shape == (2, 40, 8, 8), y2.shape
    assert bool(jnp.all(jnp.isfinite(y2)))
    assert bool(jnp.allclose(y2, r2, atol=2e-3, rtol=2e-3)), \
        float(jnp.max(jnp.abs(y2 - r2)))

    print("KERNEL_OK")
</pallas_src>

<mosaic_0001>
module attributes {stable_mosaic.version = 11 : i64} {
  func.func @kernel(%arg0: i32, %arg1: memref<1x16x16x32xf32, #tpu.memory_space<vmem>>, %arg2: memref<32x128xf32, #tpu.memory_space<vmem>>, %arg3: memref<1x128xf32, #tpu.memory_space<vmem>>, %arg4: memref<9x128xf32, #tpu.memory_space<vmem>>, %arg5: memref<1x128xf32, #tpu.memory_space<vmem>>, %arg6: memref<128x32xf32, #tpu.memory_space<vmem>>, %arg7: memref<1x32xf32, #tpu.memory_space<vmem>>, %arg8: memref<32x128xf32, #tpu.memory_space<vmem>>, %arg9: memref<1x128xf32, #tpu.memory_space<vmem>>, %arg10: memref<128x32xf32, #tpu.memory_space<vmem>>, %arg11: memref<1x32xf32, #tpu.memory_space<vmem>>, %arg12: memref<1x16x16x32xf32, #tpu.memory_space<vmem>>, %arg13: memref<18x18x128xf32, #tpu.memory_space<vmem>>) attributes {dimension_semantics = [#tpu.dimension_semantics<parallel>], iteration_bounds = array<i64: 2>, scalar_prefetch = 0 : i64, scratch_operands = 1 : i64, tpu.core_type = #tpu.core_type<tc>, window_params = [{transform_indices = @transform_0, window_bounds = array<i64: 1, 16, 16, 32>}, {pipeline_mode = #tpu.pipeline_mode<synchronous>, transform_indices = @transform_1, window_bounds = array<i64: 32, 128>}, {pipeline_mode = #tpu.pipeline_mode<synchronous>, transform_indices = @transform_2, window_bounds = array<i64: 1, 128>}, {pipeline_mode = #tpu.pipeline_mode<synchronous>, transform_indices = @transform_3, window_bounds = array<i64: 9, 128>}, {pipeline_mode = #tpu.pipeline_mode<synchronous>, transform_indices = @transform_4, window_bounds = array<i64: 1, 128>}, {pipeline_mode = #tpu.pipeline_mode<synchronous>, transform_indices = @transform_5, window_bounds = array<i64: 128, 32>}, {pipeline_mode = #tpu.pipeline_mode<synchronous>, transform_indices = @transform_6, window_bounds = array<i64: 1, 32>}, {pipeline_mode = #tpu.pipeline_mode<synchronous>, transform_indices = @transform_7, window_bounds = array<i64: 32, 128>}, {pipeline_mode = #tpu.pipeline_mode<synchronous>, transform_indices = @transform_8, window_bounds = array<i64: 1, 128>}, {pipeline_mode = #tpu.pipeline_mode<synchronous>, transform_indices = @transform_9, window_bounds = array<i64: 128, 32>}, {pipeline_mode = #tpu.pipeline_mode<synchronous>, transform_indices = @transform_10, window_bounds = array<i64: 1, 32>}, {transform_indices = @transform_11, window_bounds = array<i64: 1, 16, 16, 32>}]} {
    %c0 = arith.constant 0 : index
    %c0_0 = arith.constant 0 : index
    %c0_1 = arith.constant 0 : index
    %c0_2 = arith.constant 0 : index
    %0 = vector.load %arg1[%c0, %c0_0, %c0_1, %c0_2] : memref<1x16x16x32xf32, #tpu.memory_space<vmem>>, vector<1x16x16x32xf32>
    %1 = vector.shape_cast %0 : vector<1x16x16x32xf32> to vector<16x16x32xf32>
    %c0_3 = arith.constant 0 : index
    %c0_4 = arith.constant 0 : index
    %2 = vector.load %arg2[%c0_3, %c0_4] : memref<32x128xf32, #tpu.memory_space<vmem>>, vector<32x128xf32>
    %c0_5 = arith.constant 0 : index
    %c0_6 = arith.constant 0 : index
    %3 = vector.load %arg3[%c0_5, %c0_6] : memref<1x128xf32, #tpu.memory_space<vmem>>, vector<1x128xf32>
    %4 = vector.shape_cast %1 : vector<16x16x32xf32> to vector<256x32xf32>
    %cst = arith.constant dense<0.000000e+00> : vector<256x128xf32>
    %5 = tpu.matmul %4, %2, %cst {dimension_numbers = #tpu.dot_dimension_numbers<[1], [0], [0], [1], [0, 0, 1, 1], [], []>} : vector<256x32xf32>, vector<32x128xf32>, vector<256x128xf32> -> vector<256x128xf32>
    %6 = vector.broadcast %3 : vector<1x128xf32> to vector<256x128xf32>
    %7 = arith.addf %5, %6 : vector<256x128xf32>
    %cst_7 = arith.constant 3.000000e+00 : f32
    %8 = vector.broadcast %cst_7 : f32 to vector<256x128xf32>
    %9 = arith.addf %7, %8 : vector<256x128xf32>
    %cst_8 = arith.constant 0.000000e+00 : f32
    %cst_9 = arith.constant 6.000000e+00 : f32
    %10 = vector.broadcast %cst_8 : f32 to vector<256x128xf32>
    %11 = arith.maximumf %10, %9 : vector<256x128xf32>
    %12 = vector.broadcast %cst_9 : f32 to vector<256x128xf32>
    %13 = arith.minimumf %12, %11 : vector<256x128xf32>
    %cst_10 = arith.constant 0.166666672 : f32
    %14 = vector.broadcast %cst_10 : f32 to vector<256x128xf32>
    %15 = arith.mulf %13, %14 : vector<256x128xf32>
    %16 = arith.mulf %7, %15 : vector<256x128xf32>
    %17 = vector.shape_cast %16 : vector<256x128xf32> to vector<16x16x128xf32>
    %c0_11 = arith.constant 0 : index
    %c0_12 = arith.constant 0 : index
    %18 = vector.load %arg4[%c0_11, %c0_12] : memref<9x128xf32, #tpu.memory_space<vmem>>, vector<9x128xf32>
    %c0_13 = arith.constant 0 : index
    %c0_14 = arith.constant 0 : index
    %19 = vector.load %arg5[%c0_13, %c0_14] : memref<1x128xf32, #tpu.memory_space<vmem>>, vector<1x128xf32>
    %cst_15 = arith.constant 0.000000e+00 : f32
    %20 = vector.broadcast %cst_15 : f32 to vector<1x18x128xf32>
    %c0_16 = arith.constant 0 : index
    %c0_17 = arith.constant 0 : index
    %c0_18 = arith.constant 0 : index
    %21 = vector.load %arg13[%c0_16, %c0_17, %c0_18] : memref<18x18x128xf32, #tpu.memory_space<vmem>>, vector<1x18x128xf32>
    tpu.vector_store %arg13[%c0_16, %c0_17, %c0_18], %20 {strides = array<i32>} : memref<18x18x128xf32, #tpu.memory_space<vmem>>, vector<1x18x128xf32>,
    %cst_19 = arith.constant 0.000000e+00 : f32
    %22 = vector.broadcast %cst_19 : f32 to vector<1x18x128xf32>
    %c17 = arith.constant 17 : index
    %c0_20 = arith.constant 0 : index
    %c0_21 = arith.constant 0 : index
    %23 = vector.load %arg13[%c17, %c0_20, %c0_21] : memref<18x18x128xf32, #tpu.memory_space<vmem>>, vector<1x18x128xf32>
    tpu.vector_store %arg13[%c17, %c0_20, %c0_21], %22 {strides = array<i32>} : memref<18x18x128xf32, #tpu.memory_space<vmem>>, vector<1x18x128xf32>,
    %cst_22 = arith.constant 0.000000e+00 : f32
    %24 = vector.broadcast %cst_22 : f32 to vector<18x1x128xf32>
    %c0_23 = arith.constant 0 : index
    %c0_24 = arith.constant 0 : index
    %c0_25 = arith.constant 0 : index
    %25 = vector.load %arg13[%c0_23, %c0_24, %c0_25] : memref<18x18x128xf32, #tpu.memory_space<vmem>>, vector<18x1x128xf32>
    tpu.vector_store %arg13[%c0_23, %c0_24, %c0_25], %24 {strides = array<i32>} : memref<18x18x128xf32, #tpu.memory_space<vmem>>, vector<18x1x128xf32>,
    %cst_26 = arith.constant 0.000000e+00 : f32
    %26 = vector.broadcast %cst_26 : f32 to vector<18x1x128xf32>
    %c0_27 = arith.constant 0 : index
    %c17_28 = arith.constant 17 : index
    %c0_29 = arith.constant 0 : index
    %27 = vector.load %arg13[%c0_27, %c17_28, %c0_29] : memref<18x18x128xf32, #tpu.memory_space<vmem>>, vector<18x1x128xf32>
    tpu.vector_store %arg13[%c0_27, %c17_28, %c0_29], %26 {strides = array<i32>} : memref<18x18x128xf32, #tpu.memory_space<vmem>>, vector<18x1x128xf32>,
    %c1 = arith.constant 1 : index
    %c1_30 = arith.constant 1 : index
    %c0_31 = arith.constant 0 : index
    %28 = vector.load %arg13[%c1, %c1_30, %c0_31] : memref<18x18x128xf32, #tpu.memory_space<vmem>>, vector<16x16x128xf32>
    tpu.vector_store %arg13[%c1, %c1_30, %c0_31], %17 {strides = array<i32>} : memref<18x18x128xf32, #tpu.memory_space<vmem>>, vector<16x16x128xf32>,
    %c0_32 = arith.constant 0 : index
    %c0_33 = arith.constant 0 : index
    %c0_34 = arith.constant 0 : index
    %29 = vector.load %arg13[%c0_32, %c0_33, %c0_34] : memref<18x18x128xf32, #tpu.memory_space<vmem>>, vector<16x16x128xf32>
    %30 = vector.extract_strided_slice %18 {offsets = [0, 0], sizes = [1, 128], strides = [1, 1]} : vector<9x128xf32> to vector<1x128xf32>
    %31 = vector.shape_cast %30 : vector<1x128xf32> to vector<128xf32>
    %32 = vector.shape_cast %31 : vector<128xf32> to vector<1x1x128xf32>
    %33 = vector.broadcast %32 : vector<1x1x128xf32> to vector<16x16x128xf32>
    %34 = arith.mulf %29, %33 : vector<16x16x128xf32>
    %c0_35 = arith.constant 0 : index
    %c1_36 = arith.constant 1 : index
    %c0_37 = arith.constant 0 : index
    %35 = vector.load %arg13[%c0_35, %c1_36, %c0_37] : memref<18x18x128xf32, #tpu.memory_space<vmem>>, vector<16x16x128xf32>
    %36 = vector.extract_strided_slice %18 {offsets = [1, 0], sizes = [1, 128], strides = [1, 1]} : vector<9x128xf32> to vector<1x128xf32>
    %37 = vector.shape_cast %36 : vector<1x128xf32> to vector<128xf32>
    %38 = vector.shape_cast %37 : vector<128xf32> to vector<1x1x128xf32>
    %39 = vector.broadcast %38 : vector<1x1x128xf32> to vector<16x16x128xf32>
    %40 = arith.mulf %35, %39 : vector<16x16x128xf32>
    %41 = arith.addf %34, %40 : vector<16x16x128xf32>
    %c0_38 = arith.constant 0 : index
    %c2 = arith.constant 2 : index
    %c0_39 = arith.constant 0 : index
    %42 = vector.load %arg13[%c0_38, %c2, %c0_39] : memref<18x18x128xf32, #tpu.memory_space<vmem>>, vector<16x16x128xf32>
    %43 = vector.extract_strided_slice %18 {offsets = [2, 0], sizes = [1, 128], strides = [1, 1]} : vector<9x128xf32> to vector<1x128xf32>
    %44 = vector.shape_cast %43 : vector<1x128xf32> to vector<128xf32>
    %45 = vector.shape_cast %44 : vector<128xf32> to vector<1x1x128xf32>
    %46 = vector.broadcast %45 : vector<1x1x128xf32> to vector<16x16x128xf32>
    %47 = arith.mulf %42, %46 : vector<16x16x128xf32>
    %48 = arith.addf %41, %47 : vector<16x16x128xf32>
    %c1_40 = arith.constant 1 : index
    %c0_41 = arith.constant 0 : index
    %c0_42 = arith.constant 0 : index
    %49 = vector.load %arg13[%c1_40, %c0_41, %c0_42] : memref<18x18x128xf32, #tpu.memory_space<vmem>>, vector<16x16x128xf32>
    %50 = vector.extract_strided_slice %18 {offsets = [3, 0], sizes = [1, 128], strides = [1, 1]} : vector<9x128xf32> to vector<1x128xf32>
    %51 = vector.shape_cast %50 : vector<1x128xf32> to vector<128xf32>
    %52 = vector.shape_cast %51 : vector<128xf32> to vector<1x1x128xf32>
    %53 = vector.broadcast %52 : vector<1x1x128xf32> to vector<16x16x128xf32>
    %54 = arith.mulf %49, %53 : vector<16x16x128xf32>
    %55 = arith.addf %48, %54 : vector<16x16x128xf32>
    %c1_43 = arith.constant 1 : index
    %c1_44 = arith.constant 1 : index
    %c0_45 = arith.constant 0 : index
    %56 = vector.load %arg13[%c1_43, %c1_44, %c0_45] : memref<18x18x128xf32, #tpu.memory_space<vmem>>, vector<16x16x128xf32>
    %57 = vector.extract_strided_slice %18 {offsets = [4, 0], sizes = [1, 128], strides = [1, 1]} : vector<9x128xf32> to vector<1x128xf32>
    %58 = vector.shape_cast %57 : vector<1x128xf32> to vector<128xf32>
    %59 = vector.shape_cast %58 : vector<128xf32> to vector<1x1x128xf32>
    %60 = vector.broadcast %59 : vector<1x1x128xf32> to vector<16x16x128xf32>
    %61 = arith.mulf %56, %60 : vector<16x16x128xf32>
    %62 = arith.addf %55, %61 : vector<16x16x128xf32>
    %c1_46 = arith.constant 1 : index
    %c2_47 = arith.constant 2 : index
    %c0_48 = arith.constant 0 : index
    %63 = vector.load %arg13[%c1_46, %c2_47, %c0_48] : memref<18x18x128xf32, #tpu.memory_space<vmem>>, vector<16x16x128xf32>
    %64 = vector.extract_strided_slice %18 {offsets = [5, 0], sizes = [1, 128], strides = [1, 1]} : vector<9x128xf32> to vector<1x128xf32>
    %65 = vector.shape_cast %64 : vector<1x128xf32> to vector<128xf32>
    %66 = vector.shape_cast %65 : vector<128xf32> to vector<1x1x128xf32>
    %67 = vector.broadcast %66 : vector<1x1x128xf32> to vector<16x16x128xf32>
    %68 = arith.mulf %63, %67 : vector<16x16x128xf32>
    %69 = arith.addf %62, %68 : vector<16x16x128xf32>
    %c2_49 = arith.constant 2 : index
    %c0_50 = arith.constant 0 : index
    %c0_51 = arith.constant 0 : index
    %70 = vector.load %arg13[%c2_49, %c0_50, %c0_51] : memref<18x18x128xf32, #tpu.memory_space<vmem>>, vector<16x16x128xf32>
    %71 = vector.extract_strided_slice %18 {offsets = [6, 0], sizes = [1, 128], strides = [1, 1]} : vector<9x128xf32> to vector<1x128xf32>
    %72 = vector.shape_cast %71 : vector<1x128xf32> to vector<128xf32>
    %73 = vector.shape_cast %72 : vector<128xf32> to vector<1x1x128xf32>
    %74 = vector.broadcast %73 : vector<1x1x128xf32> to vector<16x16x128xf32>
    %75 = arith.mulf %70, %74 : vector<16x16x128xf32>
    %76 = arith.addf %69, %75 : vector<16x16x128xf32>
    %c2_52 = arith.constant 2 : index
    %c1_53 = arith.constant 1 : index
    %c0_54 = arith.constant 0 : index
    %77 = vector.load %arg13[%c2_52, %c1_53, %c0_54] : memref<18x18x128xf32, #tpu.memory_space<vmem>>, vector<16x16x128xf32>
    %78 = vector.extract_strided_slice %18 {offsets = [7, 0], sizes = [1, 128], strides = [1, 1]} : vector<9x128xf32> to vector<1x128xf32>
    %79 = vector.shape_cast %78 : vector<1x128xf32> to vector<128xf32>
    %80 = vector.shape_cast %79 : vector<128xf32> to vector<1x1x128xf32>
    %81 = vector.broadcast %80 : vector<1x1x128xf32> to vector<16x16x128xf32>
    %82 = arith.mulf %77, %81 : vector<16x16x128xf32>
    %83 = arith.addf %76, %82 : vector<16x16x128xf32>
    %c2_55 = arith.constant 2 : index
    %c2_56 = arith.constant 2 : index
    %c0_57 = arith.constant 0 : index
    %84 = vector.load %arg13[%c2_55, %c2_56, %c0_57] : memref<18x18x128xf32, #tpu.memory_space<vmem>>, vector<16x16x128xf32>
    %85 = vector.extract_strided_slice %18 {offsets = [8, 0], sizes = [1, 128], strides = [1, 1]} : vector<9x128xf32> to vector<1x128xf32>
    %86 = vector.shape_cast %85 : vector<1x128xf32> to vector<128xf32>
    %87 = vector.shape_cast %86 : vector<128xf32> to vector<1x1x128xf32>
    %88 = vector.broadcast %87 : vector<1x1x128xf32> to vector<16x16x128xf32>
    %89 = arith.mulf %84, %88 : vector<16x16x128xf32>
    %90 = arith.addf %83, %89 : vector<16x16x128xf32>
    %91 = vector.shape_cast %19 : vector<1x128xf32> to vector<1x1x128xf32>
    %92 = vector.broadcast %91 : vector<1x1x128xf32> to vector<16x16x128xf32>
    %93 = arith.addf %90, %92 : vector<16x16x128xf32>
    %94 = vector.shape_cast %93 : vector<16x16x128xf32> to vector<256x128xf32>
    %c0_58 = arith.constant 0 : index
    %c0_59 = arith.constant 0 : index
    %95 = vector.load %arg6[%c0_58, %c0_59] : memref<128x32xf32, #tpu.memory_space<vmem>>, vector<128x32xf32>
    %c0_60 = arith.constant 0 : index
    %c0_61 = arith.constant 0 : index
    %96 = vector.load %arg7[%c0_60, %c0_61] : memref<1x32xf32, #tpu.memory_space<vmem>>, vector<1x32xf32>
    %c0_62 = arith.constant 0 : index
    %c0_63 = arith.constant 0 : index
    %97 = vector.load %arg8[%c0_62, %c0_63] : memref<32x128xf32, #tpu.memory_space<vmem>>, vector<32x128xf32>
    %c0_64 = arith.constant 0 : index
    %c0_65 = arith.constant 0 : index
    %98 = vector.load %arg9[%c0_64, %c0_65] : memref<1x128xf32, #tpu.memory_space<vmem>>, vector<1x128xf32>
    %cst_66 = arith.constant dense<0.000000e+00> : vector<128xf32>
    %99 = vector.multi_reduction <add>, %94, %cst_66 [0] : vector<256x128xf32> to vector<128xf32>
    %100 = vector.shape_cast %99 : vector<128xf32> to vector<1x128xf32>
    %cst_67 = arith.constant 2.560000e+02 : f32
    %101 = vector.broadcast %cst_67 : f32 to vector<1x128xf32>
    %102 = arith.divf %100, %101 : vector<1x128xf32>
    %cst_68 = arith.constant dense<0.000000e+00> : vector<1x32xf32>
    %103 = tpu.matmul %102, %95, %cst_68 {dimension_numbers = #tpu.dot_dimension_numbers<[1], [0], [0], [1], [0, 0, 1, 1], [], []>} : vector<1x128xf32>, vector<128x32xf32>, vector<1x32xf32> -> vector<1x32xf32>
    %104 = arith.addf %103, %96 : vector<1x32xf32>
    %cst_69 = arith.constant 0.000000e+00 : f32
    %105 = vector.broadcast %cst_69 : f32 to vector<1x32xf32>
    %106 = arith.maximumf %104, %105 : vector<1x32xf32>
    %cst_70 = arith.constant dense<0.000000e+00> : vector<1x128xf32>
    %107 = tpu.matmul %106, %97, %cst_70 {dimension_numbers = #tpu.dot_dimension_numbers<[1], [0], [0], [1], [0, 0, 1, 1], [], []>} : vector<1x32xf32>, vector<32x128xf32>, vector<1x128xf32> -> vector<1x128xf32>
    %108 = arith.addf %107, %98 : vector<1x128xf32>
    %cst_71 = arith.constant 3.000000e+00 : f32
    %109 = vector.broadcast %cst_71 : f32 to vector<1x128xf32>
    %110 = arith.addf %108, %109 : vector<1x128xf32>
    %cst_72 = arith.constant 0.000000e+00 : f32
    %cst_73 = arith.constant 6.000000e+00 : f32
    %111 = vector.broadcast %cst_72 : f32 to vector<1x128xf32>
    %112 = arith.maximumf %111, %110 : vector<1x128xf32>
    %113 = vector.broadcast %cst_73 : f32 to vector<1x128xf32>
    %114 = arith.minimumf %113, %112 : vector<1x128xf32>
    %cst_74 = arith.constant 0.166666672 : f32
    %115 = vector.broadcast %cst_74 : f32 to vector<1x128xf32>
    %116 = arith.mulf %114, %115 : vector<1x128xf32>
    %117 = vector.broadcast %116 : vector<1x128xf32> to vector<256x128xf32>
    %118 = arith.mulf %94, %117 : vector<256x128xf32>
    %c0_75 = arith.constant 0 : index
    %c0_76 = arith.constant 0 : index
    %119 = vector.load %arg10[%c0_75, %c0_76] : memref<128x32xf32, #tpu.memory_space<vmem>>, vector<128x32xf32>
    %c0_77 = arith.constant 0 : index
    %c0_78 = arith.constant 0 : index
    %120 = vector.load %arg11[%c0_77, %c0_78] : memref<1x32xf32, #tpu.memory_space<vmem>>, vector<1x32xf32>
    %cst_79 = arith.constant dense<0.000000e+00> : vector<256x32xf32>
    %121 = tpu.matmul %118, %119, %cst_79 {dimension_numbers = #tpu.dot_dimension_numbers<[1], [0], [0], [1], [0, 0, 1, 1], [], []>} : vector<256x128xf32>, vector<128x32xf32>, vector<256x32xf32> -> vector<256x32xf32>
    %122 = vector.broadcast %120 : vector<1x32xf32> to vector<256x32xf32>
    %123 = arith.addf %121, %122 : vector<256x32xf32>
    %124 = vector.shape_cast %1 : vector<16x16x32xf32> to vector<256x32xf32>
    %125 = arith.addf %123, %124 : vector<256x32xf32>
    %126 = vector.shape_cast %125 : vector<256x32xf32> to vector<16x16x32xf32>
    %c0_80 = arith.constant 0 : index
    %c0_81 = arith.constant 0 : index
    %c0_82 = arith.constant 0 : index
    %c0_83 = arith.constant 0 : index
    %127 = vector.load %arg12[%c0_80, %c0_81, %c0_82, %c0_83] : memref<1x16x16x32xf32, #tpu.memory_space<vmem>>, vector<1x16x16x32xf32>
    %128 = vector.shape_cast %127 : vector<1x16x16x32xf32> to vector<16x16x32xf32>
    %129 = vector.shape_cast %126 : vector<16x16x32xf32> to vector<1x16x16x32xf32>
    tpu.vector_store %arg12[%c0_80, %c0_81, %c0_82, %c0_83], %129 {strides = array<i32>} : memref<1x16x16x32xf32, #tpu.memory_space<vmem>>, vector<1x16x16x32xf32>,
    return
  }
  func.func @transform_0(%arg0: i32) -> (i32, i32, i32, i32) {
    %c0_i32 = arith.constant 0 : i32
    %c0_i32_0 = arith.constant 0 : i32
    %c0_i32_1 = arith.constant 0 : i32
    %c0_i32_2 = arith.constant 0 : i32
    return %arg0, %c0_i32, %c0_i32_0, %c0_i32_1 : i32, i32, i32, i32
  }
  func.func @transform_1(%arg0: i32) -> (i32, i32) {
    %c0_i32 = arith.constant 0 : i32
    %c0_i32_0 = arith.constant 0 : i32
    %c0_i32_1 = arith.constant 0 : i32
    return %c0_i32, %c0_i32_0 : i32, i32
  }
  func.func @transform_2(%arg0: i32) -> (i32, i32) {
    %c0_i32 = arith.constant 0 : i32
    %c0_i32_0 = arith.constant 0 : i32
    %c0_i32_1 = arith.constant 0 : i32
    return %c0_i32, %c0_i32_0 : i32, i32
  }
  func.func @transform_3(%arg0: i32) -> (i32, i32) {
    %c0_i32 = arith.constant 0 : i32
    %c0_i32_0 = arith.constant 0 : i32
    %c0_i32_1 = arith.constant 0 : i32
    return %c0_i32, %c0_i32_0 : i32, i32
  }
  func.func @transform_4(%arg0: i32) -> (i32, i32) {
    %c0_i32 = arith.constant 0 : i32
    %c0_i32_0 = arith.constant 0 : i32
    %c0_i32_1 = arith.constant 0 : i32
    return %c0_i32, %c0_i32_0 : i32, i32
  }
  func.func @transform_5(%arg0: i32) -> (i32, i32) {
    %c0_i32 = arith.constant 0 : i32
    %c0_i32_0 = arith.constant 0 : i32
    %c0_i32_1 = arith.constant 0 : i32
    return %c0_i32, %c0_i32_0 : i32, i32
  }
  func.func @transform_6(%arg0: i32) -> (i32, i32) {
    %c0_i32 = arith.constant 0 : i32
    %c0_i32_0 = arith.constant 0 : i32
    %c0_i32_1 = arith.constant 0 : i32
    return %c0_i32, %c0_i32_0 : i32, i32
  }
  func.func @transform_7(%arg0: i32) -> (i32, i32) {
    %c0_i32 = arith.constant 0 : i32
    %c0_i32_0 = arith.constant 0 : i32
    %c0_i32_1 = arith.constant 0 : i32
    return %c0_i32, %c0_i32_0 : i32, i32
  }
  func.func @transform_8(%arg0: i32) -> (i32, i32) {
    %c0_i32 = arith.constant 0 : i32
    %c0_i32_0 = arith.constant 0 : i32
    %c0_i32_1 = arith.constant 0 : i32
    return %c0_i32, %c0_i32_0 : i32, i32
  }
  func.func @transform_9(%arg0: i32) -> (i32, i32) {
    %c0_i32 = arith.constant 0 : i32
    %c0_i32_0 = arith.constant 0 : i32
    %c0_i32_1 = arith.constant 0 : i32
    return %c0_i32, %c0_i32_0 : i32, i32
  }
  func.func @transform_10(%arg0: i32) -> (i32, i32) {
    %c0_i32 = arith.constant 0 : i32
    %c0_i32_0 = arith.constant 0 : i32
    %c0_i32_1 = arith.constant 0 : i32
    return %c0_i32, %c0_i32_0 : i32, i32
  }
  func.func @transform_11(%arg0: i32) -> (i32, i32, i32, i32) {
    %c0_i32 = arith.constant 0 : i32
    %c0_i32_0 = arith.constant 0 : i32
    %c0_i32_1 = arith.constant 0 : i32
    %c0_i32_2 = arith.constant 0 : i32
    return %arg0, %c0_i32, %c0_i32_0, %c0_i32_1 : i32, i32, i32, i32
  }
}

</mosaic_0001>

<bundles_post_ra>
// kernel: tpu_custom_call.1
= control target key start
LH: loop header
LB: loop body
LE: loop exit
PB: predicated region body
PF: predicated region fallthrough
CT: control target
= control target key end

     0   :  { %16 = vsyncpa [#allocation4], 0  ;;  %s4741_s0 = inlined_call_operand.hbm [shape: f32[2,16,16,32], index: 0, kind: input, shape index: {}]   ;;  %s4742_s1 = inlined_call_operand.vmem [shape: f32[32,128], index: 1, kind: input, shape index: {}]   ;;  %s4743_s2 = inlined_call_operand.vmem [shape: f32[1,128], index: 2, kind: input, shape index: {}]   ;;  %s4744_s3 = inlined_call_operand.vmem [shape: f32[9,128], index: 3, kind: input, shape index: {}]   ;;  %s4745_s4 = inlined_call_operand.vmem [shape: f32[1,128], index: 4, kind: input, shape index: {}]   ;;  %s4746_s5 = inlined_call_operand.vmem [shape: f32[128,32], index: 5, kind: input, shape index: {}]   ;;  %s4747_s6 = inlined_call_operand.vmem [shape: f32[1,32], index: 6, kind: input, shape index: {}]   ;;  %s4748_s7 = inlined_call_operand.vmem [shape: f32[32,128], index: 7, kind: input, shape index: {}]   ;;  %s4749_s8 = inlined_call_operand.vmem [shape: f32[1,128], index: 8, kind: input, shape index: {}]   ;;  %s4750_s9 = inlined_call_operand.vmem [shape: f32[128,32], index: 9, kind: input, shape index: {}]   ;;  %s4751_s10 = inlined_call_operand.vmem [shape: f32[1,32], index: 10, kind: input, shape index: {}]   ;;  %s4752_s11 = inlined_call_operand.hbm [shape: f32[2,16,16,32], index: 11, kind: output, shape index: {}]  }
   0x1   :  { %18 = vsyncpa [#allocation4 + $0x1], 0 }
   0x2   :  { %19 = vsyncpa [#allocation5], 0 }
   0x3   :  { %21 = vsyncpa [#allocation5 + $0x1], 0  ;;  %s3227_s17 = smov 0   ;;  %s3229_s18 = smov 0  }
   0x4   :  { %s3231_s19 = smov 0   ;;  %s3233_s20 = smov 0  }
   0x5 LB: > { %4781 = sst [smem:[#allocation9_spill]] %s3152_s19  ;;  %s3248_s21 = sadd.s32 4294967295, %s3156_s20   ;;  %s3156_s20 = sphi %s3233_s20, %s4848_s20   ;;  %s3152_s19 = sphi %s3231_s19, %s4845_s19   ;;  %s3148_s18 = sphi %s3229_s18, %s4847_s18   ;;  %s3144_s17 = sphi %s3227_s17, %s4846_s17  }
   0x6   : > { %s2560_s22 = sadd.s32 4294967294, %s3156_s20   ;;  %s3252_s23 = sadd.s32 1, %s3156_s20  }
   0x7   : > { %s34_s24 = sadd.s32 1, %s3152_s19  ;;  %s31_s25 = ssub.s32 %s3156_s20, %s3252_s23 }
   0x8   : > { %p41_p0 = scmp.ne.s32.totalorder %s3152_s19, %s3148_s18  ;;  %p32_p1 = scmp.eq.s32.totalorder %s31_s25, 0 }
   0x9   : > { %p42_p2 = scmp.eq.s32.totalorder %s3156_s20, 0  ;;  %p47_p3 = scmp.ne.s32.totalorder %s3148_s18, %s3144_s17 }
   0xa   : > { %p48_p4 = scmp.eq.s32.totalorder %s3248_s21, 0  ;;  %p281_p7 = scmp.eq.s32.totalorder %s3248_s21, 1 }
   0xb   : > { %s3264_s26 = scalar_select %p32_p1, %s3152_s19, %s34_s24  }
   0xc   : > { %p3266_p5 = por %p42_p2, %p41_p0  ;;  %p3270_p6 = por %p48_p4, %p47_p3 }
   0xd   : > { %4782 = sst [smem:[#allocation10_spill]] %s3264_s26  ;;  %p287_p8 = scmp.eq.s32.totalorder %s2560_s22, 1 }
   0xe   : > { %p2983_p10 = scmp.lt.s32.totalorder %s3156_s20, 2  ;;  %p3277_p11 = por %p281_p7, %p41_p0 }
   0xf   : > { %p3281_p12 = por %p287_p8, %p47_p3  ;;  %s337_s12 = sand.u32 1, %s3152_s19  }
  0x10   : > { %s4785_s29 = scalar_select %p3277_p11, 1, 0 }
  0x11   : > { %s4786_s30 = scalar_select %p3281_p12, 1, 0 }
  0x12   : > { %s2611_s13 = sshll.u32 %s3156_s20, 12  ;;  %s2563_s14 = sshll.u32 %s337_s12, 8 }
  0x13   : > { %s3290_s24 = scalar_lea.hbm %s4741_s0, %s2611_s13  ;;  %s341_s22 = scalar_lea.vmem [#allocation3], %s2563_s14 }
  0x14   : > { %s348_s25 = sshll.u32 %s341_s22, 4  ;;  %p3294_p13 = pnand %p2983_p10, %p3266_p5  ;;  %s3298_s25 = int_to_ptr.vmem [resolvable:$true] %s348_s25 }
  0x15   : > { %s3300_s19 = scalar_lea.sflag [#allocation4], %s337_s12  ;;  %s3060_s15 = scalar_lea.hbm %s3290_s24, 4096 }
  0x16   : > { %p3061_p0 = scmp.ne.s32.totalorder %s3290_s24, %s3060_s15  ;;  %p3062_p1 = pneg %p3294_p13 }
  0x17   : > { %s3065_s14 = scalar_lea.hbm %s4741_s0, 8192  ;;  %p3066_p4 = scmp.lt.u32.totalorder %s3290_s24, %s4741_s0 }
  0x18   : > { %p3063_p2 = pnand %p3062_p1, %p3061_p0  ;;  %p3067_p5 = scmp.lt.u32.totalorder %s3065_s14, %s3060_s15 }
  0x19   : > { %p3069_p8 = scmp.lt.u32.totalorder %s3060_s15, %s3290_s24 }
  0x1a   : > { %p3064_p3 = pneg %p3063_p2  ;;  %p3068_p7 = por %p3067_p5, %p3066_p4 }
  0x1c   : > { %p3070_p10 = por %p3069_p8, %p3068_p7 }
  0x1e   : > { %p3071_p9 = pnand %p3070_p10, %p3064_p3 }
  0x20   : > { %3074 = shalt.err (!%p3071_p9)
}
  0x21   : > { %s3075_s12 = scalar_lea.vmem %s3298_s25, 4096  ;;  %s3158_s13 = smov [#allocation3]  }
  0x22   : > { %p3076_p0 = scmp.ne.s32.totalorder %s3298_s25, %s3075_s12  ;;  %s3080_s27 = sshll.u32 %s3158_s13, 4  ;;  %s3081_s27 = int_to_ptr.vmem [resolvable:$false] %s3080_s27 }
  0x23   : > { %s3082_s16 = scalar_lea.vmem %s3081_s27, 8192  ;;  %p3083_p11 = scmp.lt.s32.totalorder %s3298_s25, %s3081_s27 }
  0x24   : > { %p3078_p2 = pnand %p3076_p0, %p3062_p1  ;;  %p3084_p4 = scmp.lt.s32.totalorder %s3082_s16, %s3075_s12 }
  0x26   : > { %p3079_p12 = pneg %p3078_p2  ;;  %p3085_p5 = por %p3084_p4, %p3083_p11 }
  0x28   : > { %p3086_p7 = pnand %p3085_p5, %p3079_p12 }
  0x2a   : > { %3089 = shalt.err (!%p3086_p7)
}
  0x2b   : > { %s3159_s15 = smov 128   ;;  %s3160_s14 = smov 8  }
  0x2c   : > { %2978 = dma.hbm_to_vmem [thread:$0]  (!%p3294_p13), %s3290_s24, 4096, %s3298_s25, %s3300_s19, %s3159_s15, %s3159_s15, %s3160_s14  }
  0x2d   : > { %p2566_p9 = scmp.ge.s32.totalorder %s3156_s20, 1  ;;  %p356_p1 = scmp.lt.s32.totalorder %s3156_s20, 3 }
  0x2f   : > { %p357_p3 = pnand %p2566_p9, %p356_p1 }
  0x31   : > { %360 = sbr.rel (%p357_p3) target bundleno = 1254 (0x4e6), region = 64 }
  0x38   : > { %s3331_s22 = sand.u32 1, %s3148_s18  }
  0x39   : > { %s4780_s12 = sshll.u32 %s3331_s22, 8  ;;  %s363_s13 = scalar_lea.sflag [#allocation4], %s3331_s22 }
  0x3a   : > { %s3337_s27 = scalar_lea.vmem [#allocation3], %s4780_s12 }
  0x3b   : > { %3135 = dma.done.wait (%p3270_p6), %s363_s13, 4096  }
  0x3c   : > { %3137 = vsyncadd (%p3270_p6), %s363_s13, 4294963200  ;;  %vm448_vm0 = vcmask 261120   ;;  %v437_v0 = vld [vmem:[%s4742_s1] sm:$0xff]  ;;  %v438_v1 = vld [vmem:[%s4742_s1 + $0x8] sm:$0xff]  ;;  %v3161_v38 = vmov 0.0   ;;  %v1041_v39 = vlaneseq  ;;  %vm3163_vm1 = vmmov 0  }
  0x3d   : > { %v439_v2 = vld [vmem:[%s4742_s1 + $0x10] sm:$0xff]  ;;  %v2901_v3 = vpack.c.bf16 %v438_v1, %v437_v0  ;;  %v440_v4 = vld [vmem:[%s4742_s1 + $0x18] sm:$0xff]  ;;  %v407_v8 = vld [vmem:[%s3337_s27 + $0x10] sm:$0xff]  ;;  %959 = vst [vmem:[#allocation2 + $0x29] sm:$0x1] %v3161_v38  ;;  %s4840_s28 = sshll.u32 %s3331_s22, 8 }
  0x3e   : > { %v405_v5 = vld [vmem:[%s3337_s27] sm:$0xff]  ;;  %v2905_v6 = vpack.c.bf16 %v440_v4, %v439_v2  ;;  %v406_v7 = vld [vmem:[%s3337_s27 + $0x8] sm:$0xff]  ;;  %v408_v9 = vld [vmem:[%s3337_s27 + $0x18] sm:$0xff]  ;;  %933 = vst [vmem:[#allocation2] sm:$0xff] %v3161_v38  ;;  %v3424_v41 = vshrl.u32 %v1041_v39, 7  ;;  %s4564_s14 = scalar_lea.vmem [#allocation6], %s4840_s28 }
  0x3f   : > { %2727 = vmatprep.mubr.msk.f32.mxu1 %vm448_vm0, %v405_v5  ;;  %2902 = vmatprep.subr.bf16.mxu1 %v2901_v3  ;;  %v409_v10 = vld [vmem:[%s3337_s27 + $0x20] sm:$0xff]  ;;  %v410_v11 = vld [vmem:[%s3337_s27 + $0x28] sm:$0xff]  ;;  %v411_v12 = vld [vmem:[%s3337_s27 + $0x30] sm:$0xff]  ;;  %934 = vst [vmem:[#allocation2 + $0x8] sm:$0xff] %v3161_v38  ;;  %s2612_s13 = sshll.u32 %s3248_s21, 12  ;;  %s2487_s19 = sshll.u32 %s4564_s14, 4  ;;  %s4692_s19 = int_to_ptr.vmem [resolvable:$true] %s2487_s19 }
  0x40   : > { %2904 = vmatpush3.bf16.msra.mxu1 %v2901_v3  ;;  %v412_v13 = vld [vmem:[%s3337_s27 + $0x38] sm:$0xff]  ;;  %v413_v14 = vld [vmem:[%s3337_s27 + $0x40] sm:$0xff]  ;;  %v414_v15 = vld [vmem:[%s3337_s27 + $0x48] sm:$0xff]  ;;  %935 = vst [vmem:[#allocation2 + $0x10] sm:$0x3] %v3161_v38  ;;  %v4755_v45 = vsub.s32 0, %v3424_v41  ;;  %s4690_s24 = scalar_lea.hbm %s4752_s11, %s2612_s13 }
  0x41   : > { %2906 = vmatprep.subr.bf16.mxu1 %v2905_v6  ;;  %v415_v16 = vld [vmem:[%s3337_s27 + $0x50] sm:$0xff]  ;;  %v416_v17 = vld [vmem:[%s3337_s27 + $0x58] sm:$0xff]  ;;  %v417_v18 = vld [vmem:[%s3337_s27 + $0x60] sm:$0xff]  ;;  %937 = vst [vmem:[#allocation2 + $0x198] sm:$0xff] %v3161_v38  ;;  %v1111_v49 = vsub.s32 1, %v3424_v41  ;;  %v1211_v50 = vsub.s32 2, %v3424_v41 }
  0x42   : > { %v418_v19 = vld [vmem:[%s3337_s27 + $0x68] sm:$0xff]  ;;  %v419_v20 = vld [vmem:[%s3337_s27 + $0x70] sm:$0xff]  ;;  %v420_v21 = vld [vmem:[%s3337_s27 + $0x78] sm:$0xff]  ;;  %938 = vst [vmem:[#allocation2 + $0x1a0] sm:$0xff] %v3161_v38  ;;  %v1411_v61 = vsub.s32 4, %v3424_v41  ;;  %s2474_s21 = scalar_lea.sflag [#allocation5], %s3331_s22 }
  0x43   : > { %v421_v22 = vld [vmem:[%s3337_s27 + $0x80] sm:$0xff]  ;;  %v422_v23 = vld [vmem:[%s3337_s27 + $0x88] sm:$0xff]  ;;  %v423_v24 = vld [vmem:[%s3337_s27 + $0x90] sm:$0xff]  ;;  %939 = vst [vmem:[#allocation2 + $0x1a8] sm:$0x3] %v3161_v38  ;;  %s3090_s25 = scalar_lea.vmem %s4692_s19, 4096 }
  0x44   : > { %2908 = vmatpush3.bf16.msra.mxu1 %v2905_v6  ;;  %v424_v25 = vld [vmem:[%s3337_s27 + $0x98] sm:$0xff]  ;;  %v425_v26 = vld [vmem:[%s3337_s27 + $0xa0] sm:$0xff]  ;;  %v426_v27 = vld [vmem:[%s3337_s27 + $0xa8] sm:$0xff]  ;;  %941 = vst [vmem:[#allocation2 + $0x18] sm:$0x1] %v3161_v38  ;;  %p3091_p6 = scmp.ne.s32.totalorder %s4692_s19, %s3090_s25  ;;  %p4841_p11 = scmp.ne.s32.totalorder %s4785_s29, 0 }
  0x45   : > { %v427_v28 = vld [vmem:[%s3337_s27 + $0xb0] sm:$0xff]  ;;  %v428_v29 = vld [vmem:[%s3337_s27 + $0xb8] sm:$0xff]  ;;  %v429_v30 = vld [vmem:[%s3337_s27 + $0xc0] sm:$0xff]  ;;  %942 = vst [vmem:[#allocation2 + $0x30] sm:$0x1] %v3161_v38  ;;  %s3164_s16 = smov [#allocation6]  }
  0x46   : > { %v430_v31 = vld [vmem:[%s3337_s27 + $0xc8] sm:$0xff]  ;;  %v431_v32 = vld [vmem:[%s3337_s27 + $0xd0] sm:$0xff]  ;;  %v432_v33 = vld [vmem:[%s3337_s27 + $0xd8] sm:$0xff]  ;;  %943 = vst [vmem:[#allocation2 + $0x48] sm:$0x1] %v3161_v38  ;;  %p3092_p12 = pnand %p3091_p6, %p4841_p11  ;;  %s3094_s15 = sshll.u32 %s3164_s16, 4  ;;  %s3095_s15 = int_to_ptr.vmem [resolvable:$false] %s3094_s15 }
  0x47   : > { %2728 = vmatmul.mubr.msk.f32.vlgmr.msra.gmra.mrb[0].mxu1 %vm448_vm0, %v406_v7  ;;  %v433_v34 = vld [vmem:[%s3337_s27 + $0xe0] sm:$0xff]  ;;  %v434_v35 = vld [vmem:[%s3337_s27 + $0xe8] sm:$0xff]  ;;  %v435_v36 = vld [vmem:[%s3337_s27 + $0xf0] sm:$0xff]  ;;  %944 = vst [vmem:[#allocation2 + $0x60] sm:$0x1] %v3161_v38  ;;  %s3096_s28 = scalar_lea.vmem %s3095_s15, 8192  ;;  %p3097_p8 = scmp.lt.s32.totalorder %s4692_s19, %s3095_s15 }
  0x48   : > { %2730 = vmatprep.mubr.msk.f32.mxu1 %vm448_vm0, %v407_v8  ;;  %v436_v37 = vld [vmem:[%s3337_s27 + $0xf8] sm:$0xff]  ;;  %945 = vst [vmem:[#allocation2 + $0x78] sm:$0x1] %v3161_v38  ;;  %946 = vst [vmem:[#allocation2 + $0x90] sm:$0x1] %v3161_v38  ;;  %v3432_v48 = vld [vmem:[%s4744_s3] sm:$0xff]  ;;  %p3093_p13 = pneg %p3092_p12  ;;  %p3098_p10 = scmp.lt.s32.totalorder %s3096_s28, %s3090_s25 }
  0x49   : > { %947 = vst [vmem:[#allocation2 + $0xa8] sm:$0x1] %v3161_v38  ;;  %948 = vst [vmem:[#allocation2 + $0xc0] sm:$0x1] %v3161_v38  ;;  %v3422_v40 = vld [vmem:[%s4743_s2] ss:$0 sm:$0xff]  ;;  %v3439_v54 = vrot.slane %v3432_v48, %v4755_v45  ;;  %v3445_v63 = vrot.slane %v3432_v48, %v1111_v49  ;;  %v3448_v0 = vrot.slane %v3432_v48, %v1211_v50 }
  0x4a   : > { %949 = vst [vmem:[#allocation2 + $0xd8] sm:$0x1] %v3161_v38  ;;  %950 = vst [vmem:[#allocation2 + $0xf0] sm:$0x1] %v3161_v38  ;;  %v1077_v2 = vld [vmem:[#allocation2 + $0x1] sm:$0xff]  ;;  %v1078_v7 = vld [vmem:[#allocation2 + $0x9] sm:$0xff]  ;;  %p3099_p0 = por %p3098_p10, %p3097_p8 }
  0x4b   : > { %2731 = vmatmul.mubr.msk.f32.gmra.mrb[2].mxu1 %vm448_vm0, %v408_v9  ;;  %951 = vst [vmem:[#allocation2 + $0x108] sm:$0x1] %v3161_v38  ;;  %952 = vst [vmem:[#allocation2 + $0x120] sm:$0x1] %v3161_v38 }
  0x4c   : > { %2733 = vmatprep.mubr.msk.f32.mxu1 %vm448_vm0, %v409_v10  ;;  %953 = vst [vmem:[#allocation2 + $0x138] sm:$0x1] %v3161_v38  ;;  %954 = vst [vmem:[#allocation2 + $0x150] sm:$0x1] %v3161_v38  ;;  %p3100_p2 = pnand %p3099_p0, %p3093_p13 }
  0x4d   : > { %955 = vst [vmem:[#allocation2 + $0x168] sm:$0x1] %v3161_v38  ;;  %956 = vst [vmem:[#allocation2 + $0x180] sm:$0x1] %v3161_v38 }
  0x4e   : > { %960 = vst [vmem:[#allocation2 + $0x41] sm:$0x1] %v3161_v38  ;;  %961 = vst [vmem:[#allocation2 + $0x59] sm:$0x1] %v3161_v38 }
  0x4f   : > { %2734 = vmatmul.mubr.msk.f32.gmra.mrb[4].mxu1 %vm448_vm0, %v410_v11  ;;  %962 = vst [vmem:[#allocation2 + $0x71] sm:$0x1] %v3161_v38  ;;  %963 = vst [vmem:[#allocation2 + $0x89] sm:$0x1] %v3161_v38 }
  0x50   : > { %2736 = vmatprep.mubr.msk.f32.mxu1 %vm448_vm0, %v411_v12  ;;  %964 = vst [vmem:[#allocation2 + $0xa1] sm:$0x1] %v3161_v38  ;;  %965 = vst [vmem:[#allocation2 + $0xb9] sm:$0x1] %v3161_v38  ;;  %v1046_v12 = vmul.f32 0.0, %v3439_v54 }
  0x51   : > { %966 = vst [vmem:[#allocation2 + $0xd1] sm:$0x1] %v3161_v38  ;;  %967 = vst [vmem:[#allocation2 + $0xe9] sm:$0x1] %v3161_v38 }
  0x52   : > { %968 = vst [vmem:[#allocation2 + $0x101] sm:$0x1] %v3161_v38  ;;  %969 = vst [vmem:[#allocation2 + $0x119] sm:$0x1] %v3161_v38 }
  0x53   : > { %2737 = vmatmul.mubr.msk.f32.gmra.mrb[6].mxu1 %vm448_vm0, %v412_v13  ;;  %970 = vst [vmem:[#allocation2 + $0x131] sm:$0x1] %v3161_v38  ;;  %971 = vst [vmem:[#allocation2 + $0x149] sm:$0x1] %v3161_v38 }
  0x54   : > { %2739 = vmatprep.mubr.msk.f32.mxu1 %vm448_vm0, %v413_v14  ;;  %972 = vst [vmem:[#allocation2 + $0x161] sm:$0x1] %v3161_v38  ;;  %973 = vst [vmem:[#allocation2 + $0x179] sm:$0x1] %v3161_v38 }
  0x55   : > { %974 = vst [vmem:[#allocation2 + $0x191] sm:$0x1] %v3161_v38  ;;  %940 = vst [vmem:[#allocation2] sm:$0x1] %v3161_v38 }
  0x56   : > { %958 = vst [vmem:[#allocation2 + $0x11] sm:$0x1] %v3161_v38  ;;  %957 = vst [vmem:[#allocation2 + $0x198] sm:$0x1] %v3161_v38 }
  0x57   : > { %2740 = vmatmul.mubr.msk.f32.gmra.mrb[8].mxu1 %vm448_vm0, %v414_v15  ;;  %975 = vst [vmem:[#allocation2 + $0x1a9] sm:$0x1] %v3161_v38  ;;  %4788 = vst [vmem:[#allocation11_spill] sm:$0xff] %v3424_v41 }
  0x58   : > { %2742 = vmatprep.mubr.msk.f32.mxu1 %vm448_vm0, %v415_v16  ;;  %v1113_v16 = vmul.f32 %v3445_v63, %v1077_v2 }
  0x5b   : > { %2743 = vmatmul.mubr.msk.f32.gmra.mrb[10].mxu1 %vm448_vm0, %v416_v17 }
  0x5c   : > { %2745 = vmatprep.mubr.msk.f32.mxu1 %vm448_vm0, %v417_v18  ;;  %v1009_v58 = vld [vmem:[#allocation2] sm:$0xff] }
  0x5d   : > { %v1045_v6 = vmul.f32 %v3439_v54, %v1009_v58 }
  0x5f   : > { %2746 = vmatmul.mubr.msk.f32.gmra.mrb[12].mxu1 %vm448_vm0, %v418_v19 }
  0x60   : > { %2748 = vmatprep.mubr.msk.f32.mxu1 %vm448_vm0, %v419_v20  ;;  %v1114_v20 = vmul.f32 %v3445_v63, %v1078_v7 }
  0x62   : > { %v1146_v38 = vadd.f32 %v1114_v20, %v1046_v12 }
  0x63   : > { %2749 = vmatmul.mubr.msk.f32.gmra.mrb[14].mxu1 %vm448_vm0, %v420_v21  ;;  %v1177_v21 = vld [vmem:[#allocation2 + $0x2] sm:$0xff] }
  0x64   : > { %2751 = vmatprep.mubr.msk.f32.mxu1 %vm448_vm0, %v421_v22 }
  0x67   : > { %2752 = vmatmul.mubr.msk.f32.gmra.mrb[16].mxu1 %vm448_vm0, %v422_v23 }
  0x68   : > { %2754 = vmatprep.mubr.msk.f32.mxu1 %vm448_vm0, %v423_v24 }
  0x6b   : > { %2755 = vmatmul.mubr.msk.f32.gmra.mrb[18].mxu1 %vm448_vm0, %v424_v25  ;;  %v1178_v25 = vld [vmem:[#allocation2 + $0xa] sm:$0xff] }
  0x6c   : > { %2757 = vmatprep.mubr.msk.f32.mxu1 %vm448_vm0, %v425_v26  ;;  %v1214_v39 = vmul.f32 %v3448_v0, %v1178_v25 }
  0x6e   : > { %v1246_v58 = vadd.f32 %v1214_v39, %v1146_v38 }
  0x6f   : > { %2758 = vmatmul.mubr.msk.f32.gmra.mrb[20].mxu1 %vm448_vm0, %v426_v27  ;;  %v1712_v27 = vsub.s32 7, %v3424_v41 }
  0x70   : > { %2760 = vmatprep.mubr.msk.f32.mxu1 %vm448_vm0, %v427_v28 }
  0x73   : > { %2761 = vmatmul.mubr.msk.f32.gmra.mrb[22].mxu1 %vm448_vm0, %v428_v29 }
  0x74   : > { %2763 = vmatprep.mubr.msk.f32.mxu1 %vm448_vm0, %v429_v30  ;;  %v1511_v30 = vsub.s32 5, %v3424_v41 }
  0x77   : > { %2764 = vmatmul.mubr.msk.f32.gmra.mrb[24].mxu1 %vm448_vm0, %v430_v31  ;;  %v1311_v31 = vsub.s32 3, %v3424_v41 }
  0x78   : > { %2766 = vmatprep.mubr.msk.f32.mxu1 %vm448_vm0, %v431_v32 }
  0x7b   : > { %2767 = vmatmul.mubr.msk.f32.gmra.mrb[26].mxu1 %vm448_vm0, %v432_v33 }
  0x7c   : > { %2769 = vmatprep.mubr.msk.f32.mxu1 %vm448_vm0, %v433_v34  ;;  %v1145_v34 = vadd.f32 %v1113_v16, %v1045_v6 }
  0x7f   : > { %2770 = vmatmul.mubr.msk.f32.gmra.mrb[28].mxu1 %vm448_vm0, %v434_v35  ;;  %v1213_v35 = vmul.f32 %v3448_v0, %v1177_v21 }
  0x80   : > { %2772 = vmatprep.mubr.msk.f32.mxu1 %vm448_vm0, %v435_v36 }
  0x83   : > { %2773 = vmatmul.mubr.msk.f32.gmra.mrb[30].mxu1 %vm448_vm0, %v436_v37 }
 0x11a   : > { %v2729_v42 = vpop.f32.mrb[0].mxu1 }
 0x11b   : > { %v617_v43 = vadd.f32 %v2729_v42, %v3422_v40  ;;  %v611_v44 = vpop.f32.mrb[1].mxu1 }
 0x11c   : > { %v612_v46 = vadd.f32 %v3422_v40, %v611_v44 }
 0x11d   : > { %v771_v47 = vadd.f32 3.0, %v617_v43 }
 0x11e   : > { %v770_v51 = vadd.f32 3.0, %v612_v46  ;;  %v2732_v52 = vpop.f32.mrb[2].mxu1 }
 0x11f   : > { %v803_v53 = vmax.f32 %v771_v47, 0.0  ;;  %v627_v55 = vadd.f32 %v2732_v52, %v3422_v40  ;;  %v621_v56 = vpop.f32.mrb[3].mxu1  ;;  %v1612_v47 = vsub.s32 6, %v3424_v41 }
 0x120   : > { %v802_v57 = vmax.f32 %v770_v51, 0.0  ;;  %v622_v59 = vadd.f32 %v3422_v40, %v621_v56  ;;  %v3475_v51 = vrot.slane %v3432_v48, %v1311_v31  ;;  %v3484_v56 = vrot.slane %v3432_v48, %v1511_v30 }
 0x121   : > { %v835_v60 = vmin.f32 %v803_v53, 6.0  ;;  %v773_v62 = vadd.f32 3.0, %v627_v55  ;;  %v3479_v53 = vrot.slane %v3432_v48, %v1712_v27 }
 0x122   : > { %v834_v1 = vmin.f32 %v802_v57, 6.0  ;;  %v772_v3 = vadd.f32 3.0, %v622_v59  ;;  %v2735_v4 = vpop.f32.mrb[4].mxu1  ;;  %v1245_v57 = vadd.f32 %v1213_v35, %v1145_v34 }
 0x123   : > { %v867_v5 = vmul.f32 0.16666667, %v835_v60  ;;  %v805_v8 = vmax.f32 %v773_v62, 0.0  ;;  %v637_v9 = vadd.f32 %v2735_v4, %v3422_v40  ;;  %v631_v10 = vpop.f32.mrb[5].mxu1 }
 0x124   : > { %v866_v11 = vmul.f32 0.16666667, %v834_v1  ;;  %v804_v13 = vmax.f32 %v772_v3, 0.0  ;;  %v632_v14 = vadd.f32 %v3422_v40, %v631_v10 }
 0x125   : > { %v899_v15 = vmul.f32 %v867_v5, %v617_v43  ;;  %v837_v17 = vmin.f32 %v805_v8, 6.0  ;;  %v775_v18 = vadd.f32 3.0, %v637_v9  ;;  %v3494_v5 = vrot.slane %v3432_v48, %v1612_v47 }
 0x126   : > { %v898_v19 = vmul.f32 %v866_v11, %v612_v46  ;;  %v836_v22 = vmin.f32 %v804_v13, 6.0  ;;  %v774_v23 = vadd.f32 3.0, %v632_v14  ;;  %v2738_v24 = vpop.f32.mrb[6].mxu1  ;;  %v3468_v46 = vrot.slane %v3432_v48, %v1411_v61 }
 0x127   : > { %978 = vst [vmem:[#allocation2 + $0x21] sm:$0xff] %v899_v15  ;;  %v869_v26 = vmul.f32 0.16666667, %v837_v17  ;;  %v807_v28 = vmax.f32 %v775_v18, 0.0  ;;  %v641_v29 = vpop.f32.mrb[7].mxu1  ;;  %v1116_v61 = vmul.f32 %v3445_v63, %v899_v15  ;;  %v3508_v13 = vadd.f32 %v2738_v24, %v3422_v40 }
 0x128   : > { %977 = vst [vmem:[#allocation2 + $0x19] sm:$0xff] %v898_v19  ;;  %v868_v32 = vmul.f32 0.16666667, %v836_v22  ;;  %v806_v33 = vmax.f32 %v774_v23, 0.0  ;;  %v1414_v62 = vmul.f32 %v3468_v46, %v899_v15  ;;  %v1115_v3 = vmul.f32 %v3445_v63, %v898_v19 }
 0x129   : > { %v3460_v36 = vmul.f32 %v869_v26, %v627_v55  ;;  %v839_v37 = vmin.f32 %v807_v28, 6.0  ;;  %v1413_v11 = vmul.f32 %v3468_v46, %v898_v19 }
 0x12a   : > { %v3463_v42 = vmul.f32 %v868_v32, %v622_v59  ;;  %v838_v43 = vmin.f32 %v806_v33, 6.0  ;;  %v3465_v44 = vpop.f32.mrb[8].mxu1 }
 0x12b   : > { %980 = vst [vmem:[#allocation2 + $0x39] sm:$0xff] %v3460_v36  ;;  %v871_v49 = vmul.f32 0.16666667, %v839_v37  ;;  %v3472_v50 = vpop.f32.mrb[9].mxu1  ;;  %v1118_v48 = vmul.f32 %v3445_v63, %v3460_v36  ;;  %v1416_v38 = vmul.f32 %v3468_v46, %v3460_v36 }
 0x12c   : > { %979 = vst [vmem:[#allocation2 + $0x31] sm:$0xff] %v3463_v42  ;;  %v870_v52 = vmul.f32 0.16666667, %v838_v43  ;;  %v1117_v24 = vmul.f32 %v3445_v63, %v3463_v42 }
 0x12d   : > { %v3481_v55 = vmul.f32 %v871_v49, %v637_v9 }
 0x12e   : > { %v3486_v59 = vmul.f32 %v870_v52, %v632_v14  ;;  %v3488_v60 = vpop.f32.mrb[10].mxu1  ;;  %v1180_v7 = vld [vmem:[#allocation2 + $0x22] sm:$0xff]  ;;  %v3511_v14 = vadd.f32 %v3422_v40, %v641_v29 }
 0x12f   : > { %v1011_v1 = vld [vmem:[#allocation2 + $0x18] sm:$0xff]  ;;  %v1012_v2 = vld [vmem:[#allocation2 + $0x20] sm:$0xff]  ;;  %982 = vst [vmem:[#allocation2 + $0x51] sm:$0xff] %v3481_v55  ;;  %v3497_v6 = vpop.f32.mrb[11].mxu1  ;;  %v1216_v19 = vmul.f32 %v3448_v0, %v1180_v7  ;;  %v1514_v31 = vmul.f32 %v3484_v56, %v1180_v7  ;;  %v1715_v7 = vmul.f32 %v3479_v53, %v3460_v36 }
 0x130   : > { %v1179_v4 = vld [vmem:[#allocation2 + $0x1a] sm:$0xff]  ;;  %v1047_v8 = vmul.f32 %v3439_v54, %v1011_v1  ;;  %v1048_v9 = vmul.f32 %v3439_v54, %v1012_v2  ;;  %v1313_v10 = vmul.f32 %v3475_v51, %v1011_v1  ;;  %981 = vst [vmem:[#allocation2 + $0x49] sm:$0xff] %v3486_v59  ;;  %v1314_v12 = vmul.f32 %v3475_v51, %v1012_v2 }
 0x131   : > { %v1215_v17 = vmul.f32 %v3448_v0, %v1179_v4  ;;  %v1513_v22 = vmul.f32 %v3484_v56, %v1179_v4  ;;  %v776_v36 = vadd.f32 3.0, %v3511_v14 }
 0x132   : > { %v1147_v15 = vadd.f32 %v1115_v3, %v1047_v8  ;;  %v1148_v16 = vadd.f32 %v1116_v61, %v1048_v9  ;;  %v1345_v18 = vadd.f32 %v1313_v10, %v1245_v57  ;;  %v3514_v20 = vpop.f32.mrb[12].mxu1  ;;  %v1346_v21 = vadd.f32 %v1314_v12, %v1246_v58  ;;  %v1182_v49 = vld [vmem:[#allocation2 + $0x3a] sm:$0xff] }
 0x133   : > { %v1013_v23 = vld [vmem:[#allocation2 + $0x30] sm:$0xff]  ;;  %v1014_v25 = vld [vmem:[#allocation2 + $0x38] sm:$0xff]  ;;  %v3520_v26 = vpop.f32.mrb[13].mxu1  ;;  %v1415_v57 = vmul.f32 %v3468_v46, %v3463_v42  ;;  %v1714_v10 = vmul.f32 %v3479_v53, %v3463_v42  ;;  %v1218_v12 = vmul.f32 %v3448_v0, %v1182_v49  ;;  %v1516_v42 = vmul.f32 %v3484_v56, %v1182_v49 }
 0x134   : > { %v1247_v27 = vadd.f32 %v1215_v17, %v1147_v15  ;;  %v1445_v28 = vadd.f32 %v1413_v11, %v1345_v18  ;;  %v1049_v29 = vmul.f32 %v3439_v54, %v1013_v23  ;;  %v1050_v30 = vmul.f32 %v3439_v54, %v1014_v25  ;;  %v1181_v33 = vld [vmem:[#allocation2 + $0x32] sm:$0xff] }
 0x135   : > { %v1446_v32 = vadd.f32 %v1414_v62, %v1346_v21  ;;  %v1248_v34 = vadd.f32 %v1216_v19, %v1148_v16  ;;  %v1315_v35 = vmul.f32 %v3475_v51, %v1013_v23  ;;  %v1316_v43 = vmul.f32 %v3475_v51, %v1014_v25 }
 0x136   : > { %v1545_v37 = vadd.f32 %v1513_v22, %v1445_v28  ;;  %v1149_v39 = vadd.f32 %v1117_v24, %v1049_v29  ;;  %v3529_v47 = vpop.f32.mrb[14].mxu1  ;;  %v1614_v61 = vmul.f32 %v3494_v5, %v1013_v23  ;;  %v1150_v1 = vadd.f32 %v1118_v48, %v1050_v30  ;;  %v3555_v28 = vld [vmem:[%s4744_s3 + $0x8] ss:$0 sm:$0xff] }
 0x137   : > { %v1347_v52 = vadd.f32 %v1315_v35, %v1247_v27  ;;  %v1546_v58 = vadd.f32 %v1514_v31, %v1446_v32  ;;  %v3534_v62 = vpop.f32.mrb[15].mxu1  ;;  %v1217_v2 = vmul.f32 %v3448_v0, %v1181_v33  ;;  %v1348_v3 = vadd.f32 %v1316_v43, %v1248_v34  ;;  %v1015_v11 = vld [vmem:[#allocation2 + $0x48] sm:$0xff]  ;;  %v1016_v48 = vld [vmem:[#allocation2 + $0x50] sm:$0xff] }
 0x138   : > { %v1615_v4 = vmul.f32 %v3494_v5, %v1014_v25  ;;  %v1646_v9 = vadd.f32 %v1614_v61, %v1545_v37  ;;  %v1515_v19 = vmul.f32 %v3484_v56, %v1181_v33  ;;  %v777_v22 = vadd.f32 3.0, %v3508_v13 }
 0x139   : > { %v1447_v8 = vadd.f32 %v1415_v57, %v1347_v52  ;;  %v1249_v15 = vadd.f32 %v1217_v2, %v1149_v39  ;;  %v1448_v16 = vadd.f32 %v1416_v38, %v1348_v3  ;;  %v1250_v24 = vadd.f32 %v1218_v12, %v1150_v1  ;;  %v1183_v1 = vld [vmem:[#allocation2 + $0x4a] sm:$0xff] }
 0x13a   : > { %v1647_v17 = vadd.f32 %v1615_v4, %v1546_v58  ;;  %v3543_v18 = vpop.f32.mrb[16].mxu1  ;;  %v1746_v21 = vadd.f32 %v1714_v10, %v1646_v9  ;;  %v1317_v27 = vmul.f32 %v3475_v51, %v1015_v11  ;;  %v1318_v30 = vmul.f32 %v3475_v51, %v1016_v48 }
 0x13b   : > { %v3548_v23 = vpop.f32.mrb[17].mxu1  ;;  %v1547_v29 = vadd.f32 %v1515_v19, %v1447_v8  ;;  %v3560_v31 = vadd.f32 %v3465_v44, %v3422_v40  ;;  %v3564_v32 = vadd.f32 %v3422_v40, %v3472_v50  ;;  %v1418_v34 = vmul.f32 %v3468_v46, %v3481_v55 }
 0x13c   : > { %v1747_v25 = vadd.f32 %v1715_v7, %v1647_v17  ;;  %v1349_v35 = vadd.f32 %v1317_v27, %v1249_v15  ;;  %v1417_v37 = vmul.f32 %v3468_v46, %v3486_v59  ;;  %v1548_v38 = vadd.f32 %v1516_v42, %v1448_v16  ;;  %v3596_v27 = vld [vmem:[%s4745_s4] ss:$0 sm:$0xff] }
 0x13d   : > { %v1717_v43 = vmul.f32 %v3479_v53, %v3481_v55  ;;  %v1350_v52 = vadd.f32 %v1318_v30, %v1250_v24  ;;  %v1616_v44 = vmul.f32 %v3494_v5, %v1015_v11  ;;  %v1617_v57 = vmul.f32 %v3494_v5, %v1016_v48 }
 0x13e   : > { %v3570_v39 = vpop.f32.mrb[18].mxu1  ;;  %v1815_v58 = vmul.f32 %v3555_v28, %v1182_v49  ;;  %v1814_v61 = vmul.f32 %v3555_v28, %v1181_v33  ;;  %v3580_v2 = vadd.f32 %v1417_v37, %v1349_v35  ;;  %v1716_v3 = vmul.f32 %v3479_v53, %v3486_v59 }
 0x13f   : > { %v3576_v50 = vpop.f32.mrb[19].mxu1  ;;  %v3584_v4 = vadd.f32 %v1418_v34, %v1350_v52  ;;  %v1648_v7 = vadd.f32 %v1616_v44, %v1547_v29  ;;  %v1649_v8 = vadd.f32 %v1617_v57, %v1548_v38  ;;  %v809_v9 = vmax.f32 %v777_v22, 0.0 }
 0x140   : > { %v1846_v10 = vadd.f32 %v1814_v61, %v1746_v21  ;;  %v1847_v12 = vadd.f32 %v1815_v58, %v1747_v25  ;;  %v1120_v15 = vmul.f32 %v3445_v63, %v3481_v55  ;;  %v808_v16 = vmax.f32 %v776_v36, 0.0  ;;  %v1184_v25 = vld [vmem:[#allocation2 + $0x52] sm:$0xff] }
 0x141   : > { %v1748_v33 = vadd.f32 %v1716_v3, %v1648_v7  ;;  %v1749_v17 = vadd.f32 %v1717_v43, %v1649_v8  ;;  %v1816_v19 = vmul.f32 %v3555_v28, %v1183_v1  ;;  %v841_v42 = vmin.f32 %v809_v9, 6.0 }
 0x142   : > { %v3588_v49 = vpop.f32.mrb[20].mxu1  ;;  %v840_v21 = vmin.f32 %v808_v16, 6.0  ;;  %v779_v22 = vadd.f32 3.0, %v3560_v31  ;;  %v778_v55 = vadd.f32 3.0, %v3564_v32  ;;  %v667_v36 = vadd.f32 %v3488_v60, %v3422_v40 }
 0x143   : > { %v3591_v24 = vpop.f32.mrb[21].mxu1  ;;  %v1051_v29 = vmul.f32 %v3439_v54, %v1015_v11  ;;  %v1052_v30 = vmul.f32 %v3439_v54, %v1016_v48  ;;  %v1848_v34 = vadd.f32 %v1816_v19, %v1748_v33  ;;  %v873_v35 = vmul.f32 0.16666667, %v841_v42 }
 0x144   : > { %v872_v37 = vmul.f32 0.16666667, %v840_v21  ;;  %v811_v38 = vmax.f32 %v779_v22, 0.0  ;;  %v810_v43 = vmax.f32 %v778_v55, 0.0  ;;  %v781_v52 = vadd.f32 3.0, %v667_v36 }
 0x145   : > { %v3607_v57 = vadd.f32 %v3596_v27, %v1846_v10  ;;  %v3610_v58 = vadd.f32 %v3596_v27, %v1847_v12  ;;  %v1119_v60 = vmul.f32 %v3445_v63, %v3486_v59  ;;  %v905_v11 = vmul.f32 %v873_v35, %v3508_v13 }
 0x146   : > { %v3604_v44 = vpop.f32.mrb[22].mxu1  ;;  %v904_v61 = vmul.f32 %v872_v37, %v3511_v14  ;;  %v843_v3 = vmin.f32 %v811_v38, 6.0  ;;  %v842_v7 = vmin.f32 %v810_v43, 6.0  ;;  %v813_v8 = vmax.f32 %v781_v52, 0.0 }
 0x147   : > { %4789 = vst [vmem:[#allocation12_spill] sm:$0xff] %v3607_v57  ;;  %4790 = vst [vmem:[#allocation13_spill] sm:$0xff] %v3610_v58  ;;  %v3615_v48 = vpop.f32.mrb[23].mxu1  ;;  %v1817_v9 = vmul.f32 %v3555_v28, %v1184_v25  ;;  %v3620_v10 = vadd.f32 %v3596_v27, %v1848_v34  ;;  %v1151_v12 = vadd.f32 %v1119_v60, %v1051_v29 }
 0x148   : > { %984 = vst [vmem:[#allocation2 + $0x69] sm:$0xff] %v905_v11  ;;  %v1152_v16 = vadd.f32 %v1120_v15, %v1052_v30  ;;  %983 = vst [vmem:[#allocation2 + $0x61] sm:$0xff] %v904_v61  ;;  %v875_v33 = vmul.f32 0.16666667, %v843_v3  ;;  %v3624_v59 = vadd.f32 %v3422_v40, %v3497_v6  ;;  %v1938_v14 = vadd.f32 %v3610_v58, %v3607_v57 }
 0x149   : > { %4791 = vst [vmem:[#allocation14_spill] sm:$0xff] %v3620_v10  ;;  %v1849_v19 = vadd.f32 %v1817_v9, %v1749_v17  ;;  %v874_v42 = vmul.f32 0.16666667, %v842_v7  ;;  %v845_v21 = vmin.f32 %v813_v8, 6.0  ;;  %v1220_v55 = vmul.f32 %v3448_v0, %v1184_v25 }
 0x14a   : > { %v3626_v13 = vpop.f32.mrb[24].mxu1  ;;  %v1219_v15 = vmul.f32 %v3448_v0, %v1183_v1  ;;  %v3635_v29 = vmul.f32 %v875_v33, %v3560_v31  ;;  %v1517_v6 = vmul.f32 %v3484_v56, %v1183_v1  ;;  %v1939_v30 = vadd.f32 %v1938_v14, %v3620_v10 }
 0x14b   : > { %v3630_v22 = vpop.f32.mrb[25].mxu1  ;;  %v3640_v34 = vmul.f32 %v874_v42, %v3564_v32  ;;  %v877_v35 = vmul.f32 0.16666667, %v845_v21  ;;  %v1518_v17 = vmul.f32 %v3484_v56, %v1184_v25  ;;  %v780_v38 = vadd.f32 3.0, %v3624_v59 }
 0x14c   : > { %v1251_v37 = vadd.f32 %v1219_v15, %v1151_v12  ;;  %986 = vst [vmem:[#allocation2 + $0x81] sm:$0xff] %v3635_v29  ;;  %v1549_v31 = vadd.f32 %v1517_v6, %v3580_v2  ;;  %v3649_v52 = vadd.f32 %v3596_v27, %v1849_v19  ;;  %v1252_v1 = vadd.f32 %v1220_v55, %v1152_v16 }
 0x14d   : > { %985 = vst [vmem:[#allocation2 + $0x79] sm:$0xff] %v3640_v34  ;;  %v3652_v32 = vmul.f32 %v877_v35, %v667_v36  ;;  %v1122_v25 = vmul.f32 %v3445_v63, %v905_v11  ;;  %v1420_v3 = vmul.f32 %v3468_v46, %v905_v11  ;;  %v1719_v7 = vmul.f32 %v3479_v53, %v905_v11 }
 0x14e   : > { %v3645_v43 = vpop.f32.mrb[26].mxu1  ;;  %4792 = vst [vmem:[#allocation15_spill] sm:$0xff] %v3649_v52  ;;  %v1550_v8 = vadd.f32 %v1518_v17, %v3584_v4  ;;  %v1121_v12 = vmul.f32 %v3445_v63, %v904_v61  ;;  %v1419_v16 = vmul.f32 %v3468_v46, %v904_v61  ;;  %v1718_v36 = vmul.f32 %v3479_v53, %v904_v61 }
 0x14f   : > { %v3654_v60 = vpop.f32.mrb[27].mxu1  ;;  %v1017_v9 = vld [vmem:[#allocation2 + $0x60] sm:$0xff]  ;;  %v1018_v2 = vld [vmem:[#allocation2 + $0x68] sm:$0xff]  ;;  %v3664_v14 = vadd.f32 %v1939_v30, %v3649_v52  ;;  %988 = vst [vmem:[#allocation2 + $0x99] sm:$0xff] %v3652_v32  ;;  %v812_v42 = vmax.f32 %v780_v38, 0.0  ;;  %v3677_v30 = vadd.f32 %v3514_v20, %v3422_v40  ;;  %v3684_v38 = vadd.f32 %v3422_v40, %v3520_v26 }
 0x150   : > { %4793 = vst [vmem:[#allocation16_spill] sm:$0xff] %v3654_v60  ;;  %v1185_v33 = vld [vmem:[#allocation2 + $0x62] sm:$0xff]  ;;  %v1053_v19 = vmul.f32 %v3439_v54, %v1017_v9  ;;  %v1054_v11 = vmul.f32 %v3439_v54, %v1018_v2  ;;  %v1319_v4 = vmul.f32 %v3475_v51, %v1017_v9  ;;  %v1186_v55 = vld [vmem:[#allocation2 + $0x6a] sm:$0xff]  ;;  %v1320_v15 = vmul.f32 %v3475_v51, %v1018_v2 }
 0x151   : > { %v1618_v6 = vmul.f32 %v3494_v5, %v1017_v9  ;;  %v1619_v61 = vmul.f32 %v3494_v5, %v1018_v2  ;;  %v1221_v45 = vmul.f32 %v3448_v0, %v1185_v33  ;;  %v1222_v2 = vmul.f32 %v3448_v0, %v1186_v55 }
 0x152   : > { %v3670_v21 = vpop.f32.mrb[28].mxu1  ;;  %v1153_v17 = vadd.f32 %v1121_v12, %v1053_v19  ;;  %v1351_v52 = vadd.f32 %v1319_v4, %v1251_v37  ;;  %v1154_v10 = vadd.f32 %v1122_v25, %v1054_v11  ;;  %v1352_v58 = vadd.f32 %v1320_v15, %v1252_v1 }
 0x153   : > { %4794 = vst [vmem:[#allocation17_spill] sm:$0xff] %v3670_v21  ;;  %v3679_v35 = vpop.f32.mrb[29].mxu1  ;;  %v1650_v57 = vadd.f32 %v1618_v6, %v1549_v31  ;;  %v1651_v9 = vadd.f32 %v1619_v61, %v1550_v8  ;;  %v844_v20 = vmin.f32 %v812_v42, 6.0  ;;  %v1519_v31 = vmul.f32 %v3484_v56, %v1185_v33 }
 0x154   : > { %4795 = vst [vmem:[#allocation18_spill] sm:$0xff] %v3679_v35  ;;  %v1451_v41 = vadd.f32 %v1419_v16, %v1351_v52  ;;  %v1019_v21 = vld [vmem:[#allocation2 + $0x78] sm:$0xff]  ;;  %v3689_v35 = vadd.f32 %v3529_v47, %v3422_v40  ;;  %v1253_v37 = vadd.f32 %v1221_v45, %v1153_v17  ;;  %v1452_v19 = vadd.f32 %v1420_v3, %v1352_v58  ;;  %v1020_v60 = vld [vmem:[#allocation2 + $0x80] sm:$0xff] }
 0x155   : > { %v1750_v4 = vadd.f32 %v1718_v36, %v1650_v57  ;;  %v1751_v26 = vadd.f32 %v1719_v7, %v1651_v9  ;;  %v1422_v52 = vmul.f32 %v3468_v46, %v3635_v29  ;;  %v783_v1 = vadd.f32 3.0, %v3677_v30 }
 0x156   : > { %v3691_v12 = vpop.f32.mrb[30].mxu1  ;;  %v3701_v47 = vadd.f32 %v3422_v40, %v3534_v62  ;;  %v1520_v8 = vmul.f32 %v3484_v56, %v1186_v55  ;;  %v1818_v45 = vmul.f32 %v3555_v28, %v1185_v33  ;;  %v1254_v57 = vadd.f32 %v1222_v2, %v1154_v10 }
 0x157   : > { %v3693_v25 = vpop.f32.mrb[31].mxu1  ;;  %v1321_v58 = vmul.f32 %v3475_v51, %v1019_v21  ;;  %v1551_v3 = vadd.f32 %v1519_v31, %v1451_v41  ;;  %v1721_v7 = vmul.f32 %v3479_v53, %v3635_v29  ;;  %v1322_v16 = vmul.f32 %v3475_v51, %v1020_v60 }
 0x158   : > { %4796 = vst [vmem:[#allocation19_spill] sm:$0xff] %v3693_v25  ;;  %v1421_v36 = vmul.f32 %v3468_v46, %v3640_v34  ;;  %v1850_v11 = vadd.f32 %v1818_v45, %v1750_v4  ;;  %v1552_v62 = vadd.f32 %v1520_v8, %v1452_v19  ;;  %v1720_v15 = vmul.f32 %v3479_v53, %v3640_v34 }
 0x159   : > { %v1353_v42 = vadd.f32 %v1321_v58, %v1253_v37  ;;  %v1354_v6 = vadd.f32 %v1322_v16, %v1254_v57  ;;  %v1620_v10 = vmul.f32 %v3494_v5, %v1019_v21  ;;  %v1621_v33 = vmul.f32 %v3494_v5, %v1020_v60 }
 0x15a   : > { %v876_v41 = vmul.f32 0.16666667, %v844_v20  ;;  %v815_v17 = vmax.f32 %v783_v1, 0.0  ;;  %v782_v9 = vadd.f32 3.0, %v3684_v38  ;;  %v785_v2 = vadd.f32 3.0, %v3689_v35  ;;  %v1188_v20 = vld [vmem:[#allocation2 + $0x82] sm:$0xff] }
 0x15b   : > { %v1453_v61 = vadd.f32 %v1421_v36, %v1353_v42  ;;  %v1055_v31 = vmul.f32 %v3439_v54, %v1019_v21  ;;  %v1454_v4 = vadd.f32 %v1422_v52, %v1354_v6  ;;  %v1652_v37 = vadd.f32 %v1620_v10, %v1551_v3  ;;  %v1187_v3 = vld [vmem:[#allocation2 + $0x7a] sm:$0xff] }
 0x15c   : > { %v1653_v19 = vadd.f32 %v1621_v33, %v1552_v62  ;;  %v1819_v8 = vmul.f32 %v3555_v28, %v1186_v55  ;;  %v3720_v45 = vadd.f32 %v3596_v27, %v1850_v11  ;;  %v1124_v57 = vmul.f32 %v3445_v63, %v3635_v29 }
 0x15d   : > { %v1123_v1 = vmul.f32 %v3445_v63, %v3640_v34  ;;  %v1056_v58 = vmul.f32 %v3439_v54, %v1020_v60  ;;  %v1752_v16 = vadd.f32 %v1720_v15, %v1652_v37  ;;  %v908_v21 = vmul.f32 %v876_v41, %v3624_v59 }
 0x15e   : > { %4797 = vst [vmem:[#allocation20_spill] sm:$0xff] %v3720_v45  ;;  %v1753_v36 = vadd.f32 %v1721_v7, %v1653_v19  ;;  %v1851_v52 = vadd.f32 %v1819_v8, %v1751_v26  ;;  %v847_v42 = vmin.f32 %v815_v17, 6.0  ;;  %v814_v55 = vmax.f32 %v782_v9, 0.0  ;;  %v1190_v7 = vld [vmem:[#allocation2 + $0x9a] sm:$0xff] }
 0x15f   : > { %v817_v62 = vmax.f32 %v785_v2, 0.0  ;;  %v1224_v11 = vmul.f32 %v3448_v0, %v1188_v20  ;;  %v1155_v6 = vadd.f32 %v1123_v1, %v1055_v31  ;;  %v1126_v29 = vmul.f32 %v3445_v63, %v3652_v32  ;;  %987 = vst [vmem:[#allocation2 + $0x91] sm:$0xff] %v908_v21 }
 0x160   : > { %v1424_v34 = vmul.f32 %v3468_v46, %v3652_v32  ;;  %v1941_v60 = vadd.f32 %v3664_v14, %v3720_v45  ;;  %v879_v59 = vmul.f32 0.16666667, %v847_v42  ;;  %v846_v26 = vmin.f32 %v814_v55, 6.0 }
 0x161   : > { %v849_v15 = vmin.f32 %v817_v62, 6.0  ;;  %v1522_v10 = vmul.f32 %v3484_v56, %v1188_v20  ;;  %v1156_v33 = vadd.f32 %v1124_v57, %v1056_v58  ;;  %v1223_v41 = vmul.f32 %v3448_v0, %v1187_v3 }
 0x162   : > { %v1521_v17 = vmul.f32 %v3484_v56, %v1187_v3  ;;  %v3739_v9 = vadd.f32 %v3596_v27, %v1851_v52  ;;  %v3742_v2 = vmul.f32 %v879_v59, %v3677_v30  ;;  %v878_v31 = vmul.f32 0.16666667, %v846_v26 }
 0x163   : > { %v881_v37 = vmul.f32 0.16666667, %v849_v15  ;;  %v1821_v14 = vmul.f32 %v3555_v28, %v1188_v20  ;;  %v1255_v19 = vadd.f32 %v1223_v41, %v1155_v6  ;;  %v1820_v8 = vmul.f32 %v3555_v28, %v1187_v3 }
 0x164   : > { %4798 = vst [vmem:[#allocation21_spill] sm:$0xff] %v3739_v9  ;;  %v1226_v1 = vmul.f32 %v3448_v0, %v1190_v7  ;;  %v1553_v57 = vadd.f32 %v1521_v17, %v1453_v61  ;;  %v1942_v58 = vadd.f32 %v1941_v60, %v3739_v9  ;;  %v1524_v42 = vmul.f32 %v3484_v56, %v1190_v7 }
 0x165   : > { %990 = vst [vmem:[#allocation2 + $0xb1] sm:$0xff] %v3742_v2  ;;  %v3751_v52 = vmul.f32 %v878_v31, %v3684_v38  ;;  %v1852_v30 = vadd.f32 %v1820_v8, %v1752_v16  ;;  %v1723_v55 = vmul.f32 %v3479_v53, %v3652_v32  ;;  %v1256_v20 = vadd.f32 %v1224_v11, %v1156_v33 }
 0x166   : > { %v3756_v62 = vmul.f32 %v881_v37, %v3689_v35  ;;  %v1853_v3 = vadd.f32 %v1821_v14, %v1753_v36  ;;  %v1021_v6 = vld [vmem:[#allocation2 + $0x90] sm:$0xff]  ;;  %v1022_v61 = vld [vmem:[#allocation2 + $0x98] sm:$0xff]  ;;  %v1125_v60 = vmul.f32 %v3445_v63, %v908_v21  ;;  %v1423_v59 = vmul.f32 %v3468_v46, %v908_v21 }
 0x167   : > { %v1554_v26 = vadd.f32 %v1522_v10, %v1454_v4  ;;  %989 = vst [vmem:[#allocation2 + $0xa9] sm:$0xff] %v3751_v52  ;;  %v1057_v38 = vmul.f32 %v3439_v54, %v1021_v6  ;;  %v1058_v16 = vmul.f32 %v3439_v54, %v1022_v61  ;;  %v1323_v32 = vmul.f32 %v3475_v51, %v1021_v6  ;;  %v1189_v35 = vld [vmem:[#allocation2 + $0x92] sm:$0xff] }
 0x168   : > { %v1722_v11 = vmul.f32 %v3479_v53, %v908_v21  ;;  %992 = vst [vmem:[#allocation2 + $0xc9] sm:$0xff] %v3756_v62  ;;  %v1324_v36 = vmul.f32 %v3475_v51, %v1022_v61  ;;  %v1622_v15 = vmul.f32 %v3494_v5, %v1021_v6  ;;  %v1623_v33 = vmul.f32 %v3494_v5, %v1022_v61 }
 0x169   : > { %v784_v4 = vadd.f32 3.0, %v3701_v47  ;;  %v3771_v10 = vadd.f32 %v3596_v27, %v1852_v30  ;;  %v1157_v41 = vadd.f32 %v1125_v60, %v1057_v38  ;;  %v1158_v17 = vadd.f32 %v1126_v29, %v1058_v16 }
 0x16a   : > { %v1355_v31 = vadd.f32 %v1323_v32, %v1255_v19  ;;  %v1356_v37 = vadd.f32 %v1324_v36, %v1256_v20  ;;  %v1654_v14 = vadd.f32 %v1622_v15, %v1553_v57  ;;  %v1655_v21 = vadd.f32 %v1623_v33, %v1554_v26 }
 0x16b   : > { %4799 = vst [vmem:[#allocation22_spill] sm:$0xff] %v3771_v10  ;;  %v3775_v8 = vadd.f32 %v3543_v18, %v3422_v40  ;;  %v3778_v9 = vadd.f32 %v3596_v27, %v1853_v3  ;;  %v1823_v6 = vmul.f32 %v3555_v28, %v1190_v7  ;;  %v1225_v61 = vmul.f32 %v3448_v0, %v1189_v35 }
 0x16c   : > { %v1455_v45 = vadd.f32 %v1423_v59, %v1355_v31  ;;  %v1456_v30 = vadd.f32 %v1424_v34, %v1356_v37  ;;  %v1754_v25 = vadd.f32 %v1722_v11, %v1654_v14  ;;  %v1755_v60 = vadd.f32 %v1723_v55, %v1655_v21 }
 0x16d   : > { %4800 = vst [vmem:[#allocation23_spill] sm:$0xff] %v3778_v9  ;;  %v816_v29 = vmax.f32 %v784_v4, 0.0  ;;  %v1257_v19 = vadd.f32 %v1225_v61, %v1157_v41  ;;  %v1523_v57 = vmul.f32 %v3484_v56, %v1189_v35  ;;  %v1258_v38 = vadd.f32 %v1226_v1, %v1158_v17  ;;  %v1192_v61 = vld [vmem:[#allocation2 + $0xb2] sm:$0xff] }
 0x16e   : > { %v1023_v20 = vld [vmem:[#allocation2 + $0xa8] sm:$0xff]  ;;  %v1024_v26 = vld [vmem:[#allocation2 + $0xb0] sm:$0xff]  ;;  %v3785_v18 = vadd.f32 %v3422_v40, %v3548_v23  ;;  %v1943_v3 = vadd.f32 %v1942_v58, %v3771_v10  ;;  %v1822_v7 = vmul.f32 %v3555_v28, %v1189_v35  ;;  %v787_v59 = vadd.f32 3.0, %v3775_v8 }
 0x16f   : > { %v3792_v34 = vadd.f32 %v3570_v39, %v3422_v40  ;;  %v1555_v55 = vadd.f32 %v1523_v57, %v1455_v45  ;;  %v1128_v16 = vmul.f32 %v3445_v63, %v3742_v2  ;;  %v1325_v1 = vmul.f32 %v3475_v51, %v1023_v20 }
 0x170   : > { %v1326_v32 = vmul.f32 %v3475_v51, %v1024_v26  ;;  %v1854_v23 = vadd.f32 %v1822_v7, %v1754_v25  ;;  %v1426_v58 = vmul.f32 %v3468_v46, %v3742_v2  ;;  %v1425_v11 = vmul.f32 %v3468_v46, %v3751_v52 }
 0x171   : > { %v848_v35 = vmin.f32 %v816_v29, 6.0  ;;  %v1357_v36 = vadd.f32 %v1325_v1, %v1257_v19  ;;  %v1556_v39 = vadd.f32 %v1524_v42, %v1456_v30  ;;  %v1624_v45 = vmul.f32 %v3494_v5, %v1023_v20 }
 0x172   : > { %v1358_v15 = vadd.f32 %v1326_v32, %v1258_v38  ;;  %v1725_v33 = vmul.f32 %v3479_v53, %v3742_v2  ;;  %v1625_v4 = vmul.f32 %v3494_v5, %v1024_v26  ;;  %v819_v41 = vmax.f32 %v787_v59, 0.0  ;;  %v1191_v59 = vld [vmem:[#allocation2 + $0xaa] sm:$0xff] }
 0x173   : > { %v786_v25 = vadd.f32 3.0, %v3785_v18  ;;  %v1457_v17 = vadd.f32 %v1425_v11, %v1357_v36  ;;  %v1656_v37 = vadd.f32 %v1624_v45, %v1555_v55  ;;  %v1724_v14 = vmul.f32 %v3479_v53, %v3751_v52  ;;  %v1194_v45 = vld [vmem:[#allocation2 + $0xca] sm:$0xff] }
 0x174   : > { %v1458_v31 = vadd.f32 %v1426_v58, %v1358_v15  ;;  %v1944_v21 = vadd.f32 %v1943_v3, %v3778_v9  ;;  %v1127_v42 = vmul.f32 %v3445_v63, %v3751_v52  ;;  %v1657_v30 = vadd.f32 %v1625_v4, %v1556_v39 }
 0x175   : > { %v3814_v2 = vmul.f32 %v3445_v63, %v3756_v62  ;;  %v3817_v29 = vadd.f32 %v3596_v27, %v1854_v23  ;;  %v1059_v19 = vmul.f32 %v3439_v54, %v1023_v20  ;;  %v1756_v57 = vadd.f32 %v1724_v14, %v1656_v37 }
 0x176   : > { %v880_v38 = vmul.f32 0.16666667, %v848_v35  ;;  %v1060_v7 = vmul.f32 %v3439_v54, %v1024_v26  ;;  %v1757_v3 = vadd.f32 %v1725_v33, %v1657_v30  ;;  %v851_v55 = vmin.f32 %v819_v41, 6.0 }
 0x177   : > { %4801 = vst [vmem:[#allocation24_spill] sm:$0xff] %v3817_v29  ;;  %v818_v1 = vmax.f32 %v786_v25, 0.0  ;;  %v1855_v32 = vadd.f32 %v1823_v6, %v1755_v60  ;;  %v1228_v52 = vmul.f32 %v3448_v0, %v1192_v61  ;;  %v3824_v58 = vmul.f32 %v3468_v46, %v3756_v62 }
 0x178   : > { %v912_v23 = vmul.f32 %v880_v38, %v3701_v47  ;;  %v1526_v11 = vmul.f32 %v3484_v56, %v1192_v61  ;;  %v1825_v20 = vmul.f32 %v3555_v28, %v1192_v61  ;;  %v883_v35 = vmul.f32 0.16666667, %v851_v55 }
 0x179   : > { %v850_v36 = vmin.f32 %v818_v1, 6.0  ;;  %v1945_v26 = vadd.f32 %v1944_v21, %v3817_v29  ;;  %v1159_v15 = vadd.f32 %v1127_v42, %v1059_v19  ;;  %v1824_v39 = vmul.f32 %v3555_v28, %v1191_v59 }
 0x17a   : > { %v1727_v6 = vmul.f32 %v3479_v53, %v3756_v62  ;;  %991 = vst [vmem:[#allocation2 + $0xc1] sm:$0xff] %v912_v23  ;;  %v1160_v60 = vadd.f32 %v1128_v16, %v1060_v7  ;;  %v3834_v33 = vmul.f32 %v883_v35, %v3775_v8  ;;  %v789_v4 = vadd.f32 3.0, %v3792_v34 }
 0x17b   : > { %v882_v47 = vmul.f32 0.16666667, %v850_v36  ;;  %v3838_v41 = vadd.f32 %v3596_v27, %v1855_v32  ;;  %v1227_v25 = vmul.f32 %v3448_v0, %v1191_v59  ;;  %v1856_v37 = vadd.f32 %v1824_v39, %v1756_v57 }
 0x17c   : > { %v3843_v14 = vadd.f32 %v3422_v40, %v3576_v50  ;;  %v1525_v62 = vmul.f32 %v3484_v56, %v1191_v59  ;;  %v1857_v16 = vadd.f32 %v1825_v20, %v1757_v3  ;;  %994 = vst [vmem:[#allocation2 + $0xe1] sm:$0xff] %v3834_v33  ;;  %v3852_v21 = vadd.f32 %v3588_v49, %v3422_v40 }
 0x17d   : > { %4802 = vst [vmem:[#allocation25_spill] sm:$0xff] %v3838_v41  ;;  %v3848_v8 = vmul.f32 %v882_v47, %v3785_v18  ;;  %v1259_v61 = vadd.f32 %v1227_v25, %v1159_v15  ;;  %v1946_v42 = vadd.f32 %v1945_v26, %v3838_v41  ;;  %v1230_v30 = vmul.f32 %v3448_v0, %v1194_v45 }
 0x17e   : > { %v1528_v50 = vmul.f32 %v3484_v56, %v1194_v45  ;;  %v1557_v19 = vadd.f32 %v1525_v62, %v1457_v17  ;;  %v3858_v57 = vmul.f32 %v3555_v28, %v1194_v45  ;;  %v1260_v38 = vadd.f32 %v1228_v52, %v1160_v60 }
 0x17f   : > { %993 = vst [vmem:[#allocation2 + $0xd9] sm:$0xff] %v3848_v8  ;;  %v821_v18 = vmax.f32 %v789_v4, 0.0  ;;  %v3862_v7 = vadd.f32 %v3596_v27, %v1856_v37  ;;  %v1129_v49 = vmul.f32 %v3445_v63, %v912_v23  ;;  %v1558_v59 = vadd.f32 %v1526_v11, %v1458_v31 }
 0x180   : > { %v788_v3 = vadd.f32 3.0, %v3843_v14  ;;  %v3867_v55 = vadd.f32 %v3596_v27, %v1857_v16  ;;  %v1427_v32 = vmul.f32 %v3468_v46, %v912_v23  ;;  %v1726_v52 = vmul.f32 %v3479_v53, %v912_v23 }
 0x181   : > { %4803 = vst [vmem:[#allocation26_spill] sm:$0xff] %v3862_v7  ;;  %v1025_v1 = vld [vmem:[#allocation2 + $0xc0] sm:$0xff]  ;;  %v1026_v17 = vld [vmem:[#allocation2 + $0xc8] sm:$0xff]  ;;  %v791_v20 = vadd.f32 3.0, %v3852_v21  ;;  %v3877_v11 = vadd.f32 %v3422_v40, %v3591_v24  ;;  %v853_v23 = vmin.f32 %v821_v18, 6.0  ;;  %v1947_v40 = vadd.f32 %v1946_v42, %v3862_v7 }
 0x182   : > { %4804 = vst [vmem:[#allocation27_spill] sm:$0xff] %v3867_v55  ;;  %v1061_v35 = vmul.f32 %v3439_v54, %v1025_v1  ;;  %v1062_v36 = vmul.f32 %v3439_v54, %v1026_v17  ;;  %v1193_v26 = vld [vmem:[#allocation2 + $0xc2] sm:$0xff]  ;;  %v1327_v31 = vmul.f32 %v3475_v51, %v1025_v1  ;;  %v1328_v15 = vmul.f32 %v3475_v51, %v1026_v17 }
 0x183   : > { %v1626_v39 = vmul.f32 %v3494_v5, %v1025_v1  ;;  %v1627_v60 = vmul.f32 %v3494_v5, %v1026_v17  ;;  %v820_v25 = vmax.f32 %v788_v3, 0.0  ;;  %v1229_v37 = vmul.f32 %v3448_v0, %v1193_v26 }
 0x184   : > { %v1161_v45 = vadd.f32 %v1129_v49, %v1061_v35  ;;  %v1162_v47 = vadd.f32 %v3814_v2, %v1062_v36  ;;  %v1359_v4 = vadd.f32 %v1327_v31, %v1259_v61  ;;  %v1360_v62 = vadd.f32 %v1328_v15, %v1260_v38 }
 0x185   : > { %v1658_v16 = vadd.f32 %v1626_v39, %v1557_v19  ;;  %v1659_v41 = vadd.f32 %v1627_v60, %v1558_v59  ;;  %v1430_v29 = vmul.f32 %v3468_v46, %v3834_v33  ;;  %v823_v9 = vmax.f32 %v791_v20, 0.0 }
 0x186   : > { %v1459_v24 = vadd.f32 %v1427_v32, %v1359_v4  ;;  %v1027_v1 = vld [vmem:[#allocation2 + $0xd8] sm:$0xff]  ;;  %v1261_v17 = vadd.f32 %v1229_v37, %v1161_v45  ;;  %v1460_v18 = vadd.f32 %v3824_v58, %v1360_v62  ;;  %v1028_v61 = vld [vmem:[#allocation2 + $0xe0] sm:$0xff]  ;;  %v1527_v3 = vmul.f32 %v3484_v56, %v1193_v26 }
 0x187   : > { %v1758_v49 = vadd.f32 %v1726_v52, %v1658_v16  ;;  %v1759_v2 = vadd.f32 %v1727_v6, %v1659_v41  ;;  %v1729_v19 = vmul.f32 %v3479_v53, %v3834_v33  ;;  %v1262_v38 = vadd.f32 %v1230_v30, %v1162_v47 }
 0x188   : > { %v790_v42 = vadd.f32 3.0, %v3877_v11  ;;  %v1826_v59 = vmul.f32 %v3555_v28, %v1193_v26  ;;  %v1329_v32 = vmul.f32 %v3475_v51, %v1027_v1  ;;  %v885_v35 = vmul.f32 0.16666667, %v853_v23 }
 0x189   : > { %v852_v20 = vmin.f32 %v820_v25, 6.0  ;;  %v1559_v36 = vadd.f32 %v1527_v3, %v1459_v24  ;;  %v1330_v58 = vmul.f32 %v3475_v51, %v1028_v61  ;;  %v1429_v6 = vmul.f32 %v3468_v46, %v3848_v8  ;;  %v1196_v3 = vld [vmem:[#allocation2 + $0xe2] sm:$0xff] }
 0x18a   : > { %v1560_v41 = vadd.f32 %v1528_v50, %v1460_v18  ;;  %v1858_v52 = vadd.f32 %v1826_v59, %v1758_v49  ;;  %v1361_v31 = vadd.f32 %v1329_v32, %v1261_v17  ;;  %v1728_v30 = vmul.f32 %v3479_v53, %v3848_v8  ;;  %v1195_v18 = vld [vmem:[#allocation2 + $0xda] sm:$0xff] }
 0x18b   : > { %v855_v15 = vmin.f32 %v823_v9, 6.0  ;;  %v1362_v39 = vadd.f32 %v1330_v58, %v1262_v38  ;;  %v1628_v26 = vmul.f32 %v3494_v5, %v1027_v1  ;;  %v1629_v60 = vmul.f32 %v3494_v5, %v1028_v61 }
 0x18c   : > { %v822_v23 = vmax.f32 %v790_v42, 0.0  ;;  %v1063_v45 = vmul.f32 %v3439_v54, %v1027_v1  ;;  %v1461_v47 = vadd.f32 %v1429_v6, %v1361_v31  ;;  %v917_v4 = vmul.f32 %v885_v35, %v3792_v34  ;;  %v3913_v34 = vld [vmem:[%s4743_s2] ss:$0 sm:$0xff] }
 0x18d   : > { %v884_v25 = vmul.f32 0.16666667, %v852_v20  ;;  %v1064_v50 = vmul.f32 %v3439_v54, %v1028_v61  ;;  %v1462_v37 = vadd.f32 %v1430_v29, %v1362_v39  ;;  %v1660_v62 = vadd.f32 %v1628_v26, %v1559_v36 }
 0x18e   : > { %v1661_v16 = vadd.f32 %v1629_v60, %v1560_v41  ;;  %v3905_v24 = vadd.f32 %v3596_v27, %v1858_v52  ;;  %v1948_v9 = vadd.f32 %v1947_v40, %v3867_v55  ;;  %v1132_v17 = vmul.f32 %v3445_v63, %v3834_v33  ;;  %996 = vst [vmem:[#allocation2 + $0xf9] sm:$0xff] %v917_v4 }
 0x18f   : > { %v3917_v29 = vadd.f32 %v3913_v34, %v3604_v44  ;;  %v1131_v1 = vmul.f32 %v3445_v63, %v3848_v8  ;;  %v1760_v49 = vadd.f32 %v1728_v30, %v1660_v62  ;;  %v916_v40 = vmul.f32 %v884_v25, %v3843_v14 }
 0x190   : > { %4805 = vst [vmem:[#allocation28_spill] sm:$0xff] %v3905_v24  ;;  %v1761_v61 = vadd.f32 %v1729_v19, %v1661_v16  ;;  %v1859_v33 = vadd.f32 %v3858_v57, %v1759_v2  ;;  %v887_v38 = vmul.f32 0.16666667, %v855_v15  ;;  %v854_v42 = vmin.f32 %v822_v23, 6.0 }
 0x191   : > { %v3925_v59 = vadd.f32 %v3913_v34, %v3615_v48  ;;  %v1163_v32 = vadd.f32 %v1131_v1, %v1063_v45  ;;  %v1164_v35 = vadd.f32 %v1132_v17, %v1064_v50  ;;  %v1828_v44 = vmul.f32 %v3555_v28, %v1195_v18  ;;  %995 = vst [vmem:[#allocation2 + $0xf1] sm:$0xff] %v916_v40 }
 0x192   : > { %v3930_v8 = vadd.f32 %v3913_v34, %v3626_v13  ;;  %v1949_v14 = vadd.f32 %v1948_v9, %v3905_v24  ;;  %v3934_v57 = vmul.f32 %v887_v38, %v3852_v21  ;;  %v886_v2 = vmul.f32 0.16666667, %v854_v42 }
 0x193   : > { %v793_v19 = vadd.f32 3.0, %v3917_v29  ;;  %v1232_v48 = vmul.f32 %v3448_v0, %v1196_v3  ;;  %v1231_v20 = vmul.f32 %v3448_v0, %v1195_v18  ;;  %v1529_v36 = vmul.f32 %v3484_v56, %v1195_v18 }
 0x194   : > { %v3942_v58 = vadd.f32 %v3913_v34, %v3630_v22  ;;  %v3945_v13 = vadd.f32 %v3596_v27, %v1859_v33  ;;  %v1530_v6 = vmul.f32 %v3484_v56, %v1196_v3  ;;  %v1860_v21 = vadd.f32 %v1828_v44, %v1760_v49  ;;  %998 = vst [vmem:[#allocation2 + $0x111] sm:$0xff] %v3934_v57 }
 0x195   : > { %v3950_v41 = vmul.f32 %v886_v2, %v3877_v11  ;;  %v1829_v52 = vmul.f32 %v3555_v28, %v1196_v3  ;;  %v1263_v31 = vadd.f32 %v1231_v20, %v1163_v32  ;;  %v1561_v30 = vadd.f32 %v1529_v36, %v1461_v47 }
 0x196   : > { %4806 = vst [vmem:[#allocation29_spill] sm:$0xff] %v3945_v13  ;;  %v1264_v15 = vadd.f32 %v1232_v48, %v1164_v35  ;;  %v1950_v39 = vadd.f32 %v1949_v14, %v3945_v13  ;;  %v1134_v22 = vmul.f32 %v3445_v63, %v917_v4  ;;  %v1432_v26 = vmul.f32 %v3468_v46, %v917_v4 }
 0x197   : > { %997 = vst [vmem:[#allocation2 + $0x109] sm:$0xff] %v3950_v41  ;;  %v825_v60 = vmax.f32 %v793_v19, 0.0  ;;  %v1861_v23 = vadd.f32 %v1829_v52, %v1761_v61  ;;  %v1731_v45 = vmul.f32 %v3479_v53, %v917_v4  ;;  %v1562_v25 = vadd.f32 %v1530_v6, %v1462_v37  ;;  %v1198_v61 = vld [vmem:[#allocation2 + $0xfa] sm:$0xff] }
 0x198   : > { %v792_v11 = vadd.f32 3.0, %v3925_v59  ;;  %v3960_v50 = vadd.f32 %v3596_v27, %v1860_v21  ;;  %v1029_v47 = vld [vmem:[#allocation2 + $0xf0] sm:$0xff]  ;;  %v1030_v62 = vld [vmem:[#allocation2 + $0xf8] sm:$0xff]  ;;  %v1133_v16 = vmul.f32 %v3445_v63, %v916_v40  ;;  %v1431_v9 = vmul.f32 %v3468_v46, %v916_v40 }
 0x199   : > { %v1730_v17 = vmul.f32 %v3479_v53, %v916_v40  ;;  %v1065_v18 = vmul.f32 %v3439_v54, %v1029_v47  ;;  %v1066_v1 = vmul.f32 %v3439_v54, %v1030_v62  ;;  %v1197_v49 = vld [vmem:[#allocation2 + $0xf2] sm:$0xff]  ;;  %v1331_v4 = vmul.f32 %v3475_v51, %v1029_v47 }
 0x19a   : > { %4807 = vst [vmem:[#allocation30_spill] sm:$0xff] %v3960_v50  ;;  %v795_v37 = vadd.f32 3.0, %v3930_v8  ;;  %v1332_v33 = vmul.f32 %v3475_v51, %v1030_v62  ;;  %v1630_v3 = vmul.f32 %v3494_v5, %v1029_v47  ;;  %v1631_v38 = vmul.f32 %v3494_v5, %v1030_v62 }
 0x19b   : > { %v857_v42 = vmin.f32 %v825_v60, 6.0  ;;  %v1165_v32 = vadd.f32 %v1133_v16, %v1065_v18  ;;  %v1166_v35 = vadd.f32 %v1134_v22, %v1066_v1  ;;  %v1363_v40 = vadd.f32 %v1331_v4, %v1263_v31 }
 0x19c   : > { %v824_v44 = vmax.f32 %v792_v11, 0.0  ;;  %v1233_v14 = vmul.f32 %v3448_v0, %v1197_v49  ;;  %v1364_v2 = vadd.f32 %v1332_v33, %v1264_v15  ;;  %v1662_v19 = vadd.f32 %v1630_v3, %v1561_v30 }
 0x19d   : > { %v1663_v48 = vadd.f32 %v1631_v38, %v1562_v25  ;;  %v3974_v20 = vadd.f32 %v3596_v27, %v1861_v23  ;;  %v1234_v36 = vmul.f32 %v3448_v0, %v1198_v61  ;;  %v1463_v6 = vadd.f32 %v1431_v9, %v1363_v40 }
 0x19e   : > { %v1031_v21 = vld [vmem:[#allocation2 + $0x108] sm:$0xff]  ;;  %v827_v52 = vmax.f32 %v795_v37, 0.0  ;;  %v1265_v47 = vadd.f32 %v1233_v14, %v1165_v32  ;;  %v1464_v62 = vadd.f32 %v1432_v26, %v1364_v2  ;;  %v1762_v60 = vadd.f32 %v1730_v17, %v1662_v19  ;;  %v1032_v22 = vld [vmem:[#allocation2 + $0x110] sm:$0xff] }
 0x19f   : > { %4808 = vst [vmem:[#allocation31_spill] sm:$0xff] %v3974_v20  ;;  %v1763_v16 = vadd.f32 %v1731_v45, %v1663_v48  ;;  %v1532_v31 = vmul.f32 %v3484_v56, %v1198_v61  ;;  %v1531_v11 = vmul.f32 %v3484_v56, %v1197_v49  ;;  %v1434_v30 = vmul.f32 %v3468_v46, %v3934_v57 }
 0x1a0   : > { %v1266_v15 = vadd.f32 %v1234_v36, %v1166_v35  ;;  %v1733_v23 = vmul.f32 %v3479_v53, %v3934_v57  ;;  %v1333_v25 = vmul.f32 %v3475_v51, %v1031_v21  ;;  %v889_v9 = vmul.f32 0.16666667, %v857_v42 }
 0x1a1   : > { %v856_v18 = vmin.f32 %v824_v44, 6.0  ;;  %v1951_v26 = vadd.f32 %v1950_v39, %v3960_v50  ;;  %v1563_v17 = vadd.f32 %v1531_v11, %v1463_v6  ;;  %v1334_v45 = vmul.f32 %v3475_v51, %v1032_v22  ;;  %v1917_v11 = vld [vmem:[%s4746_s5 + $0x8] sm:$0xff] }
 0x1a2   : > { %v1564_v1 = vadd.f32 %v1532_v31, %v1464_v62  ;;  %v1365_v4 = vadd.f32 %v1333_v25, %v1265_v47  ;;  %v1433_v37 = vmul.f32 %v3468_v46, %v3950_v41  ;;  %v1732_v33 = vmul.f32 %v3479_v53, %v3950_v41 }
 0x1a3   : > { %v859_v3 = vmin.f32 %v827_v52, 6.0  ;;  %v1366_v38 = vadd.f32 %v1334_v45, %v1266_v15  ;;  %v1632_v32 = vmul.f32 %v3494_v5, %v1031_v21  ;;  %v1633_v42 = vmul.f32 %v3494_v5, %v1032_v22 }
 0x1a4   : > { %v794_v35 = vadd.f32 3.0, %v3942_v58  ;;  %v1830_v39 = vmul.f32 %v3555_v28, %v1197_v49  ;;  %v1465_v40 = vadd.f32 %v1433_v37, %v1365_v4  ;;  %v921_v44 = vmul.f32 %v889_v9, %v3917_v29  ;;  %v4810_v37 = vld [vmem:[#allocation16_spill] sm:$0xff] }
 0x1a5   : > { %v888_v14 = vmul.f32 0.16666667, %v856_v18  ;;  %v1067_v2 = vmul.f32 %v3439_v54, %v1031_v21  ;;  %v1466_v19 = vadd.f32 %v1434_v30, %v1366_v38  ;;  %v1664_v48 = vadd.f32 %v1632_v32, %v1563_v17 }
 0x1a6   : > { %v1665_v36 = vadd.f32 %v1633_v42, %v1564_v1  ;;  %v1831_v6 = vmul.f32 %v3555_v28, %v1198_v61  ;;  %v1862_v52 = vadd.f32 %v1830_v39, %v1762_v60  ;;  %v1068_v47 = vmul.f32 %v3439_v54, %v1032_v22  ;;  %1000 = vst [vmem:[#allocation2 + $0x129] sm:$0xff] %v921_v44  ;;  %v1916_v28 = vld [vmem:[%s4746_s5] sm:$0xff]  ;;  %v4014_v60 = vld [vmem:[#allocation2 + $0x10a] sm:$0xff] }
 0x1a7   : > { %v1135_v62 = vmul.f32 %v3445_v63, %v3950_v41  ;;  %v4000_v31 = vadd.f32 %v1732_v33, %v1664_v48  ;;  %v920_v29 = vmul.f32 %v888_v14, %v3925_v59  ;;  %v4007_v21 = vadd.f32 %v3913_v34, %v3645_v43  ;;  %v4020_v43 = vld [vmem:[#allocation2 + $0x112] sm:$0xff] }
 0x1a8   : > { %v4002_v49 = vadd.f32 %v1733_v23, %v1665_v36  ;;  %v1136_v61 = vmul.f32 %v3445_v63, %v3934_v57  ;;  %v891_v41 = vmul.f32 0.16666667, %v859_v3  ;;  %v826_v22 = vmax.f32 %v794_v35, 0.0 }
 0x1a9   : > { %v1863_v59 = vadd.f32 %v1831_v6, %v1763_v16  ;;  %v1952_v30 = vadd.f32 %v1951_v26, %v3974_v20  ;;  %v1167_v15 = vadd.f32 %v1135_v62, %v1067_v2  ;;  %999 = vst [vmem:[#allocation2 + $0x121] sm:$0xff] %v920_v29  ;;  %v4766_v23 = vmov 0.0|0.0  }
 0x1aa   : > { %2909 = vmatprep.subr.bf16.mxu1 %v4766_v23  ;;  %v4024_v57 = vadd.f32 %v3596_v27, %v1862_v52  ;;  %v1168_v25 = vadd.f32 %v1136_v61, %v1068_v47  ;;  %v4027_v9 = vmul.f32 %v891_v41, %v3930_v8  ;;  %v858_v18 = vmin.f32 %v826_v22, 6.0  ;;  %v4812_v41 = vld [vmem:[#allocation17_spill] sm:$0xff] }
 0x1ab   : > { %v1235_v16 = vmul.f32 %v3448_v0, %v4014_v60  ;;  %v797_v26 = vadd.f32 3.0, %v4007_v21  ;;  %v2910_v17 = vpack.c.bf16 %v1917_v11, %v1916_v28  ;;  %v1236_v45 = vmul.f32 %v3448_v0, %v4020_v43 }
 0x1ac   : > { %4809 = vst [vmem:[#allocation32_spill] sm:$0xff] %v4024_v57  ;;  %v1533_v1 = vmul.f32 %v3484_v56, %v4014_v60  ;;  %1002 = vst [vmem:[#allocation2 + $0x141] sm:$0xff] %v4027_v9  ;;  %v890_v4 = vmul.f32 0.16666667, %v858_v18  ;;  %v4039_v8 = vadd.f32 %v3913_v34, %v4810_v37  ;;  %v4042_v33 = vadd.f32 %v3596_v27, %v1863_v59  ;;  %v1918_v37 = vld [vmem:[%s4746_s5 + $0x10] sm:$0xff] }
 0x1ad   : > { %v1534_v3 = vmul.f32 %v3484_v56, %v4020_v43  ;;  %v1267_v38 = vadd.f32 %v1235_v16, %v1167_v15  ;;  %2911 = vmatpush3.bf16.msra.mxu1 %v2910_v17  ;;  %v1953_v32 = vadd.f32 %v1952_v30, %v4024_v57  ;;  %v1268_v35 = vadd.f32 %v1236_v45, %v1168_v25  ;;  %v4065_v22 = vld [vmem:[#allocation2 + $0x12a] sm:$0xff] }
 0x1ae   : > { %4811 = vst [vmem:[#allocation16_spill] sm:$0xff] %v4042_v33  ;;  %v1565_v42 = vadd.f32 %v1533_v1, %v1465_v40  ;;  %v4048_v39 = vmul.f32 %v890_v4, %v3942_v58  ;;  %2912 = vmatprep.subr.bf16.mxu1 %v4766_v23  ;;  %v1138_v14 = vmul.f32 %v3445_v63, %v921_v44  ;;  %v829_v48 = vmax.f32 %v797_v26, 0.0 }
 0x1af   : > { %v1436_v2 = vmul.f32 %v3468_v46, %v921_v44  ;;  %v1735_v27 = vmul.f32 %v3479_v53, %v921_v44  ;;  %v1137_v52 = vmul.f32 %v3445_v63, %v920_v29  ;;  %v1435_v47 = vmul.f32 %v3468_v46, %v920_v29 }
 0x1b0   : > { %v1033_v36 = vld [vmem:[#allocation2 + $0x120] sm:$0xff]  ;;  %v1034_v6 = vld [vmem:[#allocation2 + $0x128] sm:$0xff]  ;;  %v1566_v40 = vadd.f32 %v1534_v3, %v1466_v19  ;;  %1001 = vst [vmem:[#allocation2 + $0x139] sm:$0xff] %v4048_v39  ;;  %v796_v58 = vadd.f32 3.0, %v4039_v8  ;;  %v4063_v44 = vadd.f32 %v3913_v34, %v4812_v41  ;;  %v1734_v15 = vmul.f32 %v3479_v53, %v920_v29  ;;  %v1919_v3 = vld [vmem:[%s4746_s5 + $0x18] sm:$0xff] }
 0x1b1   : > { %v1069_v62 = vmul.f32 %v3439_v54, %v1033_v36  ;;  %v1070_v28 = vmul.f32 %v3439_v54, %v1034_v6  ;;  %v1335_v61 = vmul.f32 %v3475_v51, %v1033_v36  ;;  %v4067_v11 = vld [vmem:[#allocation2 + $0x122] sm:$0xff]  ;;  %v1336_v19 = vmul.f32 %v3475_v51, %v1034_v6 }
 0x1b2   : > { %v1634_v59 = vmul.f32 %v3494_v5, %v1033_v36  ;;  %v1635_v30 = vmul.f32 %v3494_v5, %v1034_v6  ;;  %v861_v26 = vmin.f32 %v829_v48, 6.0  ;;  %v828_v4 = vmax.f32 %v796_v58, 0.0 }
 0x1b3   : > { %v1169_v25 = vadd.f32 %v1137_v52, %v1069_v62  ;;  %v1170_v18 = vadd.f32 %v1138_v14, %v1070_v28  ;;  %v1367_v16 = vadd.f32 %v1335_v61, %v1267_v38  ;;  %v1368_v17 = vadd.f32 %v1336_v19, %v1268_v35  ;;  %v4093_v52 = vld [vmem:[%s4744_s3 + $0x8] ss:$0 sm:$0xff] }
 0x1b4   : > { %v1666_v45 = vadd.f32 %v1634_v59, %v1565_v42  ;;  %v1667_v1 = vadd.f32 %v1635_v30, %v1566_v40  ;;  %v1238_v36 = vmul.f32 %v3448_v0, %v4065_v22  ;;  %v1237_v29 = vmul.f32 %v3448_v0, %v4067_v11 }
 0x1b5   : > { %v1467_v38 = vadd.f32 %v1435_v47, %v1367_v16  ;;  %v799_v35 = vadd.f32 3.0, %v4063_v44  ;;  %v1468_v42 = vadd.f32 %v1436_v2, %v1368_v17  ;;  %v1535_v14 = vmul.f32 %v3484_v56, %v4067_v11  ;;  %v4813_v16 = vld [vmem:[#allocation18_spill] sm:$0xff] }
 0x1b6   : > { %v4086_v48 = vadd.f32 %v1734_v15, %v1666_v45  ;;  %v4088_v6 = vadd.f32 %v1735_v27, %v1667_v1  ;;  %v1832_v40 = vmul.f32 %v4093_v52, %v4014_v60  ;;  %v1269_v58 = vadd.f32 %v1237_v29, %v1169_v25 }
 0x1b7   : > { %v1035_v47 = vld [vmem:[#allocation2 + $0x138] sm:$0xff]  ;;  %v1036_v62 = vld [vmem:[#allocation2 + $0x140] sm:$0xff]  ;;  %v1270_v28 = vadd.f32 %v1238_v36, %v1170_v18  ;;  %v2913_v2 = vpack.c.bf16 %v1919_v3, %v1918_v37  ;;  %v4099_v61 = vmul.f32 %v4093_v52, %v4020_v43  ;;  %v1567_v41 = vadd.f32 %v1535_v14, %v1467_v38 }
 0x1b8   : > { %v893_v27 = vmul.f32 0.16666667, %v861_v26  ;;  %v860_v19 = vmin.f32 %v828_v4, 6.0  ;;  %v1864_v59 = vadd.f32 %v1832_v40, %v4000_v31  ;;  %v4103_v30 = vadd.f32 %v1953_v32, %v4042_v33  ;;  %v1920_v14 = vld [vmem:[%s4746_s5 + $0x20] sm:$0xff] }
 0x1b9   : > { %v1337_v15 = vmul.f32 %v3475_v51, %v1035_v47  ;;  %v1338_v60 = vmul.f32 %v3475_v51, %v1036_v62  ;;  %2914 = vmatpush3.bf16.msra.mxu1 %v2913_v2  ;;  %v1438_v25 = vmul.f32 %v3468_v46, %v4027_v9  ;;  %v1636_v18 = vmul.f32 %v3494_v5, %v1035_v47 }
 0x1ba   : > { %v831_v43 = vmax.f32 %v799_v35, 0.0  ;;  %v4112_v26 = vadd.f32 %v3913_v34, %v4813_v16  ;;  %2915 = vmatprep.subr.bf16.mxu1 %v4766_v23  ;;  %v1437_v17 = vmul.f32 %v3468_v46, %v4048_v39  ;;  %v1736_v45 = vmul.f32 %v3479_v53, %v4048_v39 }
 0x1bb   : > { %v1369_v31 = vadd.f32 %v1337_v15, %v1269_v58  ;;  %v1370_v32 = vadd.f32 %v1338_v60, %v1270_v28  ;;  %v1668_v1 = vadd.f32 %v1636_v18, %v1567_v41  ;;  %v4120_v4 = vmul.f32 %v893_v27, %v4007_v21  ;;  %v1921_v21 = vld [vmem:[%s4746_s5 + $0x28] sm:$0xff]  ;;  %v1923_v15 = vld [vmem:[%s4746_s5 + $0x38] sm:$0xff]  ;;  %v4815_v18 = vld [vmem:[#allocation19_spill] sm:$0xff] }
 0x1bc   : > { %v892_v37 = vmul.f32 0.16666667, %v860_v19  ;;  %v4124_v3 = vadd.f32 %v3913_v34, %v3691_v12  ;;  %v1071_v36 = vmul.f32 %v3439_v54, %v1035_v47  ;;  %v1072_v29 = vmul.f32 %v3439_v54, %v1036_v62  ;;  %v4139_v12 = vld [vmem:[%s4745_s4] ss:$0 sm:$0xff]  ;;  %v4163_v60 = vld [vmem:[#allocation2 + $0x142] sm:$0xff] }
 0x1bd   : > { %v1469_v38 = vadd.f32 %v1437_v17, %v1369_v31  ;;  %v4128_v35 = vadd.f32 %v1438_v25, %v1370_v32  ;;  %v4142_v40 = vadd.f32 %v4139_v12, %v1864_v59  ;;  %v1536_v58 = vmul.f32 %v3484_v56, %v4065_v22  ;;  %1004 = vst [vmem:[#allocation2 + $0x159] sm:$0xff] %v4120_v4  ;;  %v1922_v59 = vld [vmem:[%s4746_s5 + $0x30] sm:$0xff] }
 0x1be   : > { %v1140_v47 = vmul.f32 %v3445_v63, %v4027_v9  ;;  %v4148_v28 = vadd.f32 %v1736_v45, %v1668_v1  ;;  %v1139_v2 = vmul.f32 %v3445_v63, %v4048_v39  ;;  %v4154_v41 = vmul.f32 %v892_v37, %v4039_v8  ;;  %4814 = vst [vmem:[#allocation17_spill] sm:$0xff] %v4163_v60  ;;  %v4169_v39 = vld [vmem:[#allocation2 + $0x13a] sm:$0xff] }
 0x1bf   : > { %v863_v27 = vmin.f32 %v831_v43, 6.0  ;;  %v798_v19 = vadd.f32 3.0, %v4112_v26  ;;  %v4167_v25 = vmul.f32 %v3479_v53, %v4027_v9  ;;  %v801_v8 = vadd.f32 3.0, %v4124_v3 }
 0x1c0   : > { %v4174_v43 = vadd.f32 %v3913_v34, %v4815_v18  ;;  %v2916_v16 = vpack.c.bf16 %v1921_v21, %v1920_v14  ;;  %v1171_v31 = vadd.f32 %v1139_v2, %v1071_v36  ;;  %v1172_v32 = vadd.f32 %v1140_v47, %v1072_v29  ;;  %1003 = vst [vmem:[#allocation2 + $0x151] sm:$0xff] %v4154_v41  ;;  %v1924_v29 = vld [vmem:[%s4746_s5 + $0x40] sm:$0xff]  ;;  %v1925_v21 = vld [vmem:[%s4746_s5 + $0x48] sm:$0xff] }
 0x1c1   : > { %v1568_v17 = vadd.f32 %v1536_v58, %v1468_v42  ;;  %v895_v45 = vmul.f32 0.16666667, %v863_v27  ;;  %v830_v1 = vmax.f32 %v798_v19, 0.0  ;;  %v833_v37 = vmax.f32 %v801_v8, 0.0 }
 0x1c2   : > { %v800_v9 = vadd.f32 3.0, %v4174_v43  ;;  %2917 = vmatpush3.bf16.msra.mxu1 %v2916_v16  ;;  %v2919_v23 = vpack.c.bf16 %v1923_v15, %v1922_v59  ;;  %v1240_v33 = vmul.f32 %v3448_v0, %v4163_v60  ;;  %v1239_v34 = vmul.f32 %v3448_v0, %v4169_v39  ;;  %v1926_v16 = vld [vmem:[%s4746_s5 + $0x50] sm:$0xff] }
 0x1c3   : > { %v1637_v14 = vmul.f32 %v3494_v5, %v1036_v62  ;;  %v4184_v36 = vmul.f32 %v895_v45, %v4063_v44  ;;  %v4816_v42 = vmov 0.0|0.0   ;;  %v1538_v58 = vmul.f32 %v3484_v56, %v4163_v60  ;;  %v1927_v45 = vld [vmem:[%s4746_s5 + $0x58] sm:$0xff] }
 0x1c4   : > { %2918 = vmatprep.subr.bf16.mxu1 %v4816_v42  ;;  %v1537_v47 = vmul.f32 %v3484_v56, %v4169_v39  ;;  %v862_v62 = vmin.f32 %v830_v1, 6.0  ;;  %v865_v2 = vmin.f32 %v833_v37, 6.0  ;;  %v1271_v44 = vadd.f32 %v1239_v34, %v1171_v31  ;;  %v4206_v1 = vld [vmem:[#allocation2 + $0x8] sm:$0xff] }
 0x1c5   : > { %v4197_v27 = vadd.f32 %v1637_v14, %v1568_v17  ;;  %1006 = vst [vmem:[#allocation2 + $0x171] sm:$0xff] %v4184_v36  ;;  %v832_v19 = vmax.f32 %v800_v9, 0.0  ;;  %v1272_v59 = vadd.f32 %v1240_v33, %v1172_v32  ;;  %v2922_v18 = vpack.c.bf16 %v1925_v21, %v1924_v29  ;;  %4817 = vst [vmem:[#allocation18_spill] sm:$0xff] %v4206_v1  ;;  %v1928_v17 = vld [vmem:[%s4746_s5 + $0x60] sm:$0xff]  ;;  %v1929_v37 = vld [vmem:[%s4746_s5 + $0x68] sm:$0xff] }
 0x1c6   : > { %v894_v15 = vmul.f32 0.16666667, %v862_v62  ;;  %v897_v8 = vmul.f32 0.16666667, %v865_v2  ;;  %2920 = vmatpush3.bf16.msra.mxu1 %v2919_v23  ;;  %2807 = vmatprep.mubr.msk.f32.mxu1 %vm3163_vm1, %v4206_v1  ;;  %v1569_v31 = vadd.f32 %v1537_v47, %v1469_v38  ;;  %v1142_v33 = vmul.f32 %v3445_v63, %v4120_v4  ;;  %v4226_v38 = vld [vmem:[%s4746_s5 + $0x70] sm:$0xff]  ;;  %v4241_v47 = vld [vmem:[%s4746_s5 + $0x78] sm:$0xff] }
 0x1c7   : > { %v1440_v23 = vmul.f32 %v3468_v46, %v4120_v4  ;;  %v1739_v32 = vmul.f32 %v3479_v53, %v4120_v4  ;;  %2921 = vmatprep.subr.bf16.mxu1 %v4816_v42  ;;  %v1037_v9 = vld [vmem:[#allocation2 + $0x150] sm:$0xff]  ;;  %v1038_v34 = vld [vmem:[#allocation2 + $0x158] sm:$0xff]  ;;  %v1141_v4 = vmul.f32 %v3445_v63, %v4154_v41  ;;  %v1439_v14 = vmul.f32 %v3468_v46, %v4154_v41 }
 0x1c8   : > { %v4233_v29 = vmul.f32 %v894_v15, %v4112_v26  ;;  %v4236_v21 = vmul.f32 %v897_v8, %v4124_v3  ;;  %v1073_v62 = vmul.f32 %v3439_v54, %v1037_v9  ;;  %v1074_v2 = vmul.f32 %v3439_v54, %v1038_v34  ;;  %v4252_v8 = vld [vmem:[#allocation2 + $0x15a] sm:$0xff]  ;;  %v4254_v13 = vld [vmem:[#allocation2 + $0x152] sm:$0xff] }
 0x1c9   : > { %v1339_v57 = vmul.f32 %v3475_v51, %v1037_v9  ;;  %v864_v20 = vmin.f32 %v832_v19, 6.0  ;;  %v1340_v50 = vmul.f32 %v3475_v51, %v1038_v34  ;;  %v1638_v26 = vmul.f32 %v3494_v5, %v1037_v9 }
 0x1ca   : > { %v1738_v3 = vmul.f32 %v3479_v53, %v4154_v41  ;;  %1005 = vst [vmem:[#allocation2 + $0x169] sm:$0xff] %v4233_v29  ;;  %1008 = vst [vmem:[#allocation2 + $0x189] sm:$0xff] %v4236_v21  ;;  %2923 = vmatpush3.bf16.msra.mxu1 %v2922_v18  ;;  %v2925_v15 = vpack.c.bf16 %v1927_v45, %v1926_v16  ;;  %v2928_v19 = vpack.c.bf16 %v1929_v37, %v1928_v17 }
 0x1cb   : > { %v1371_v24 = vadd.f32 %v1339_v57, %v1271_v44  ;;  %2924 = vmatprep.subr.bf16.mxu1 %v4816_v42  ;;  %v2931_v9 = vpack.c.bf16 %v4241_v47, %v4226_v38  ;;  %v1570_v55 = vadd.f32 %v1538_v58, %v4128_v35  ;;  %v1173_v41 = vadd.f32 %v1141_v4, %v1073_v62 }
 0x1cc   : > { %v1372_v7 = vadd.f32 %v1340_v50, %v1272_v59  ;;  %v1670_v10 = vadd.f32 %v1638_v26, %v1569_v31  ;;  %v1144_v18 = vmul.f32 %v3445_v63, %v4184_v36  ;;  %v1174_v16 = vadd.f32 %v1142_v33, %v1074_v2  ;;  %v4277_v33 = vld [vmem:[#allocation2 + $0x172] sm:$0xff] }
 0x1cd   : > { %v1471_v45 = vadd.f32 %v1439_v14, %v1371_v24  ;;  %v1639_v1 = vmul.f32 %v3494_v5, %v1038_v34  ;;  %v896_v60 = vmul.f32 0.16666667, %v864_v20  ;;  %v1242_v57 = vmul.f32 %v3448_v0, %v4252_v8 }
 0x1ce   : > { %v1241_v44 = vmul.f32 %v3448_v0, %v4254_v13  ;;  %2926 = vmatpush3.bf16.msra.mxu1 %v2925_v15  ;;  %v1442_v35 = vmul.f32 %v3468_v46, %v4184_v36  ;;  %v1472_v50 = vadd.f32 %v1440_v23, %v1372_v7  ;;  %v1540_v58 = vmul.f32 %v3484_v56, %v4252_v8 }
 0x1cf   : > { %v1539_v24 = vmul.f32 %v3484_v56, %v4254_v13  ;;  %v4274_v59 = vmul.f32 %v896_v60, %v4174_v43  ;;  %2927 = vmatprep.subr.bf16.mxu1 %v4816_v42  ;;  %v1671_v20 = vadd.f32 %v1639_v1, %v1570_v55  ;;  %v1741_v17 = vmul.f32 %v3479_v53, %v4184_v36 }
 0x1d0   : > { %v1273_v31 = vadd.f32 %v1241_v44, %v1173_v41  ;;  %v4283_v7 = vadd.f32 %v4167_v25, %v4197_v27  ;;  %v4285_v23 = vadd.f32 %v1738_v3, %v1670_v10  ;;  %v1143_v60 = vmul.f32 %v3445_v63, %v4233_v29 }
 0x1d1   : > { %v1039_v37 = vld [vmem:[#allocation2 + $0x168] sm:$0xff]  ;;  %v1040_v38 = vld [vmem:[#allocation2 + $0x170] sm:$0xff]  ;;  %1007 = vst [vmem:[#allocation2 + $0x181] sm:$0xff] %v4274_v59  ;;  %v1274_v55 = vadd.f32 %v1242_v57, %v1174_v16  ;;  %v1571_v43 = vadd.f32 %v1539_v24, %v1471_v45  ;;  %v4290_v1 = vadd.f32 %v1739_v32, %v1671_v20  ;;  %v1572_v25 = vadd.f32 %v1540_v58, %v1472_v50 }
 0x1d2   : > { %v1075_v34 = vmul.f32 %v3439_v54, %v1039_v37  ;;  %v1076_v36 = vmul.f32 %v3439_v54, %v1040_v38  ;;  %v4294_v4 = vld [vmem:[#allocation2 + $0x16a] sm:$0xff]  ;;  %v1341_v10 = vmul.f32 %v3475_v51, %v1039_v37  ;;  %2929 = vmatpush3.bf16.msra.mxu1 %v2928_v19  ;;  %v1342_v27 = vmul.f32 %v3475_v51, %v1040_v38 }
 0x1d3   : > { %v1441_v63 = vmul.f32 %v3468_v46, %v4233_v29  ;;  %v1640_v14 = vmul.f32 %v3494_v5, %v1039_v37  ;;  %2930 = vmatprep.subr.bf16.mxu1 %v4816_v42  ;;  %v1244_v32 = vmul.f32 %v3448_v0, %v4277_v33  ;;  %v1641_v2 = vmul.f32 %v3494_v5, %v1040_v38 }
 0x1d4   : > { %v1175_v47 = vadd.f32 %v1143_v60, %v1075_v34  ;;  %v1176_v54 = vadd.f32 %v1144_v18, %v1076_v36  ;;  %v1373_v62 = vadd.f32 %v1341_v10, %v1273_v31  ;;  %v1243_v26 = vmul.f32 %v3448_v0, %v4294_v4 }
 0x1d5   : > { %v1374_v3 = vadd.f32 %v1342_v27, %v1274_v55  ;;  %v1672_v15 = vadd.f32 %v1640_v14, %v1571_v43  ;;  %v1740_v19 = vmul.f32 %v3479_v53, %v4233_v29  ;;  %v1541_v16 = vmul.f32 %v3484_v56, %v4294_v4 }
 0x1d6   : > { %2932 = vmatpush3.bf16.msra.mxu1 %v2931_v9  ;;  %v1473_v41 = vadd.f32 %v1441_v63, %v1373_v62  ;;  %v1542_v45 = vmul.f32 %v3484_v56, %v4277_v33  ;;  %v1673_v18 = vadd.f32 %v1641_v2, %v1572_v25  ;;  %v1275_v57 = vadd.f32 %v1243_v26, %v1175_v47 }
 0x1d7   : > { %v1276_v44 = vadd.f32 %v1244_v32, %v1176_v54  ;;  %v1474_v50 = vadd.f32 %v1442_v35, %v1374_v3  ;;  %v1772_v58 = vadd.f32 %v1740_v19, %v1672_v15  ;;  %2933 = vmatprep.subr.bf16.mxu1 %v4816_v42  ;;  %v1834_v0 = vmul.f32 %v4093_v52, %v4067_v11  ;;  %v1508_v15 = vld [vmem:[#allocation2 + $0x18a] sm:$0xff] }
 0x1d8   : > { %v1307_v24 = vld [vmem:[#allocation2 + $0x180] sm:$0xff]  ;;  %v1308_v29 = vld [vmem:[#allocation2 + $0x188] sm:$0xff]  ;;  %v1573_v9 = vadd.f32 %v1541_v16, %v1473_v41  ;;  %v1773_v20 = vadd.f32 %v1741_v17, %v1673_v18  ;;  %v1865_v31 = vadd.f32 %v4099_v61, %v4002_v49  ;;  %v1955_v35 = vadd.f32 %v4103_v30, %v4142_v40 }
 0x1d9   : > { %v1343_v37 = vmul.f32 %v3475_v51, %v1307_v24  ;;  %v1344_v38 = vmul.f32 %v3475_v51, %v1308_v29  ;;  %v1574_v60 = vadd.f32 %v1542_v45, %v1474_v50  ;;  %v1866_v55 = vadd.f32 %v1834_v0, %v4086_v48  ;;  %v1507_v14 = vld [vmem:[#allocation2 + $0x182] sm:$0xff]  ;;  %v1708_v16 = vld [vmem:[#allocation2 + $0x199] sm:$0xff] }
 0x1da   : > { %v1642_v43 = vmul.f32 %v3494_v5, %v1307_v24  ;;  %v1643_v11 = vmul.f32 %v3494_v5, %v1308_v29  ;;  %v1443_v17 = vmul.f32 %v3468_v46, %v4274_v59  ;;  %v1444_v49 = vmul.f32 %v3468_v46, %v4236_v21  ;;  %v1709_v24 = vld [vmem:[#allocation2 + $0x1a1] sm:$0xff] }
 0x1db   : > { %v1375_v34 = vadd.f32 %v1343_v37, %v1275_v57  ;;  %v1376_v36 = vadd.f32 %v1344_v38, %v1276_v44  ;;  %v1742_v10 = vmul.f32 %v3479_v53, %v4274_v59  ;;  %v1743_v48 = vmul.f32 %v3479_v53, %v4236_v21  ;;  %v1608_v59 = vld [vmem:[#allocation2 + $0x198] sm:$0xff] }
 0x1dc   : > { %v1674_v61 = vadd.f32 %v1642_v43, %v1573_v9  ;;  %v1675_v51 = vadd.f32 %v1643_v11, %v1574_v60  ;;  %v1835_v30 = vmul.f32 %v4093_v52, %v4065_v22  ;;  %v1836_v25 = vmul.f32 %v4093_v52, %v4169_v39  ;;  %v4818_v22 = vld [vmem:[#allocation17_spill] sm:$0xff] }
 0x1dd   : > { %v1475_v27 = vadd.f32 %v1443_v17, %v1375_v34  ;;  %v1476_v63 = vadd.f32 %v1444_v49, %v1376_v36  ;;  %v4338_v46 = vadd.f32 %v4139_v12, %v1866_v55  ;;  %v4343_v21 = vadd.f32 %v4139_v12, %v1865_v31  ;;  %v1808_v60 = vld [vmem:[#allocation2 + $0x19a] sm:$0xff]  ;;  %v1809_v49 = vld [vmem:[#allocation2 + $0x1a2] sm:$0xff] }
 0x1de   : > { %v1774_v32 = vadd.f32 %v1742_v10, %v1674_v61  ;;  %v1775_v47 = vadd.f32 %v1743_v48, %v1675_v51  ;;  %v1868_v54 = vadd.f32 %v1836_v25, %v4148_v28  ;;  %v1867_v62 = vadd.f32 %v1835_v30, %v4088_v6 }
 0x1df   : > { %v1837_v2 = vmul.f32 %v4093_v52, %v4818_v22  ;;  %v1838_v39 = vmul.f32 %v4093_v52, %v4254_v13  ;;  %v1543_v26 = vmul.f32 %v3484_v56, %v1507_v14  ;;  %v1956_v3 = vadd.f32 %v1955_v35, %v4343_v21 }
 0x1e0   : > { %v1644_v19 = vmul.f32 %v3494_v5, %v1608_v59  ;;  %v4355_v45 = vadd.f32 %v4139_v12, %v1867_v62  ;;  %v4358_v18 = vadd.f32 %v4139_v12, %v1868_v54  ;;  %v1839_v57 = vmul.f32 %v4093_v52, %v4252_v8 }
 0x1e1   : > { %v1869_v28 = vadd.f32 %v1837_v2, %v4283_v7  ;;  %v1870_v6 = vadd.f32 %v1838_v39, %v4285_v23  ;;  %v1575_v41 = vadd.f32 %v1543_v26, %v1475_v27  ;;  %v1957_v13 = vadd.f32 %v1956_v3, %v4338_v46  ;;  %v4819_v23 = vld [vmem:[#allocation18_spill] sm:$0xff] }
 0x1e2   : > { %v1840_v44 = vmul.f32 %v4093_v52, %v4294_v4  ;;  %v1544_v7 = vmul.f32 %v3484_v56, %v1508_v15  ;;  %v1645_v50 = vmul.f32 %v4819_v23, %v3494_v5  ;;  %v1744_v29 = vmul.f32 %v3479_v53, %v1708_v16 }
 0x1e3   : > { %v1958_v0 = vadd.f32 %v1957_v13, %v4355_v45  ;;  %v1871_v9 = vadd.f32 %v1839_v57, %v4290_v1  ;;  %v4372_v37 = vadd.f32 %v4139_v12, %v1869_v28  ;;  %v1676_v38 = vadd.f32 %v1644_v19, %v1575_v41  ;;  %v1933_v28 = vld [vmem:[%s4748_s7] sm:$0xff]  ;;  %v1935_v13 = vld [vmem:[%s4748_s7 + $0x10] sm:$0xff]  ;;  %v1936_v57 = vld [vmem:[%s4748_s7 + $0x18] sm:$0xff] }
 0x1e4   : > { %v1872_v31 = vadd.f32 %v1840_v44, %v1772_v58  ;;  %v1576_v8 = vadd.f32 %v1544_v7, %v1476_v63  ;;  %v4375_v4 = vadd.f32 %v4139_v12, %v1870_v6  ;;  %v1841_v5 = vmul.f32 %v4093_v52, %v4277_v33  ;;  %v1934_v6 = vld [vmem:[%s4748_s7 + $0x8] sm:$0xff]  ;;  %v2161_v7 = vld [vmem:[%s4750_s9] sm:$0xff] }
 0x1e5   : > { %v1959_v56 = vadd.f32 %v1958_v0, %v4358_v18  ;;  %v1842_v35 = vmul.f32 %v4093_v52, %v1507_v14  ;;  %v1745_v55 = vmul.f32 %v3479_v53, %v1709_v24  ;;  %v1844_v58 = vmul.f32 %v4093_v52, %v1808_v60  ;;  %v2164_v0 = vld [vmem:[%s4750_s9 + $0x18] sm:$0xff] }
 0x1e6   : > { %v1873_v43 = vadd.f32 %v1841_v5, %v1773_v20  ;;  %v4385_v34 = vadd.f32 %v4139_v12, %v1871_v9  ;;  %v1677_v36 = vadd.f32 %v1645_v50, %v1576_v8  ;;  %v1776_v17 = vadd.f32 %v1744_v29, %v1676_v38  ;;  %v2165_v29 = vld [vmem:[%s4750_s9 + $0x20] sm:$0xff]  ;;  %v2166_v9 = vld [vmem:[%s4750_s9 + $0x28] sm:$0xff]  ;;  %v2167_v8 = vld [vmem:[%s4750_s9 + $0x30] sm:$0xff] }
 0x1e7   : > { %v1960_v1 = vadd.f32 %v1959_v56, %v4372_v37  ;;  %v1874_v11 = vadd.f32 %v1842_v35, %v1774_v32  ;;  %v4388_v61 = vadd.f32 %v4139_v12, %v1872_v31  ;;  %v1843_v51 = vmul.f32 %v4093_v52, %v1508_v15  ;;  %v2168_v38 = vld [vmem:[%s4750_s9 + $0x38] sm:$0xff]  ;;  %v1932_v56 = vld [vmem:[%s4747_s6] sm:$0x1] }
 0x1e8   : > { %v1845_v10 = vmul.f32 %v4093_v52, %v1809_v49  ;;  %v4395_v20 = vadd.f32 %v4139_v12, %v1873_v43  ;;  %v1777_v30 = vadd.f32 %v1745_v55, %v1677_v36  ;;  %v1876_v25 = vadd.f32 %v1844_v58, %v1776_v17  ;;  %v2169_v58 = vld [vmem:[%s4750_s9 + $0x40] sm:$0xff]  ;;  %v2170_v43 = vld [vmem:[%s4750_s9 + $0x48] sm:$0xff]  ;;  %v2171_v36 = vld [vmem:[%s4750_s9 + $0x50] sm:$0xff] }
 0x1e9   : > { %v1961_v33 = vadd.f32 %v1960_v1, %v4375_v4  ;;  %v1875_v48 = vadd.f32 %v1843_v51, %v1775_v47  ;;  %v4398_v27 = vadd.f32 %v4139_v12, %v1874_v11  ;;  %v2937_v44 = vpack.c.bf16 %v1936_v57, %v1935_v13  ;;  %v2172_v17 = vld [vmem:[%s4750_s9 + $0x58] sm:$0xff]  ;;  %v2174_v51 = vld [vmem:[%s4750_s9 + $0x68] sm:$0xff] }
 0x1ea   : > { %v1877_v32 = vadd.f32 %v1845_v10, %v1777_v30  ;;  %v4406_v59 = vadd.f32 %v4139_v12, %v1876_v25  ;;  %v2947_v31 = vpack.c.bf16 %v2166_v9, %v2165_v29  ;;  %v2951_v60 = vpack.c.bf16 %v2168_v38, %v2167_v8  ;;  %v2175_v10 = vld [vmem:[%s4750_s9 + $0x70] sm:$0xff]  ;;  %v1937_v25 = vld [vmem:[%s4749_s8] sm:$0x1]  ;;  %v4826_v57 = vld [vmem:[#allocation20_spill] sm:$0xff] }
 0x1eb   : > { %v1962_v53 = vadd.f32 %v1961_v33, %v4385_v34  ;;  %v4403_v54 = vadd.f32 %v4139_v12, %v1875_v48  ;;  %v2955_v11 = vpack.c.bf16 %v2170_v43, %v2169_v58  ;;  %v2959_v49 = vpack.c.bf16 %v2172_v17, %v2171_v36  ;;  %v2173_v33 = vld [vmem:[%s4750_s9 + $0x60] sm:$0xff]  ;;  %v2176_v48 = vld [vmem:[%s4750_s9 + $0x78] sm:$0xff]  ;;  %v4832_v38 = vld [vmem:[#allocation26_spill] sm:$0xff] }
 0x1ec   : > { %v4411_v62 = vadd.f32 %v4139_v12, %v1877_v32  ;;  %v2934_v12 = vpack.c.bf16 %v1934_v6, %v1933_v28  ;;  %v2967_v30 = vpack.c.bf16 %v2176_v48, %v2175_v10  ;;  %v4823_v28 = vld [vmem:[#allocation13_spill] sm:$0xff]  ;;  %v4830_v29 = vld [vmem:[#allocation24_spill] sm:$0xff]  ;;  %v4836_v43 = vld [vmem:[#allocation30_spill] sm:$0xff] }
 0x1ed   : > { %v1963_v63 = vadd.f32 %v1962_v53, %v4388_v61  ;;  %v2963_v53 = vpack.c.bf16 %v2174_v51, %v2173_v33  ;;  %v4837_v36 = vld [vmem:[#allocation31_spill] sm:$0xff]  ;;  %v4839_v51 = vld [vmem:[#allocation16_spill] sm:$0xff] }
 0x1ef   : > { %v1964_v14 = vadd.f32 %v1963_v63, %v4395_v20 }
 0x1f1   : > { %v1965_v52 = vadd.f32 %v1964_v14, %v4398_v27 }
 0x1f3   : > { %v1966_v47 = vadd.f32 %v1965_v52, %v4403_v54 }
 0x1f5   : > { %v1967_v22 = vadd.f32 %v1966_v47, %v4406_v59 }
 0x1f7   : > { %v1968_v2 = vadd.f32 %v1967_v22, %v4411_v62 }
 0x1f9   : > { %v1969_v39 = vrot.slane %v1968_v2, 4 }
 0x1fb   : > { %v1970_v26 = vadd.f32 %v1969_v39, %v1968_v2  ;;  %v4820_v39 = vld [vmem:[#allocation11_spill] sm:$0xff] }
 0x1fd   : > { %v1971_v3 = vrot.slane %v1970_v26, 2 }
 0x1ff   : > { %v1972_v15 = vadd.f32 %v1971_v3, %v1970_v26  ;;  %v4821_v26 = vsub.s32 0, %v4820_v39 }
 0x201   : > { %v1973_v19 = vrot.slane %v1972_v15, 1 }
 0x203   : > { %v1974_v41 = vadd.f32 %v1973_v19, %v1972_v15  ;;  %v4822_v15 = vld [vmem:[#allocation12_spill] sm:$0xff] }
 0x205   : > { %v1976_v16 = vmul.f32 0.00390625, %v1974_v41  ;;  %v4824_v41 = vld [vmem:[#allocation14_spill] sm:$0xff] }
 0x207   : > { %2808 = vmatmul.mubr.f32.vlgmr.msra.gmra.mrb[32].mxu1 %v1976_v16  ;;  %v4825_v16 = vld [vmem:[#allocation15_spill] sm:$0xff] }
 0x208   : > { %2935 = vmatpush3.bf16.msra.mxu1 %v2934_v12  ;;  %2818 = vmatprep.mubr.msk.f32.mxu1 %vm3163_vm1, %v4819_v23  ;;  %v2162_v23 = vld [vmem:[%s4750_s9 + $0x8] sm:$0xff] }
 0x209   : > { %2936 = vmatprep.subr.bf16.mxu1 %v4816_v42  ;;  %v2163_v42 = vld [vmem:[%s4750_s9 + $0x10] sm:$0xff]  ;;  %v2939_v50 = vpack.c.bf16 %v2162_v23, %v2161_v7  ;;  %v4827_v7 = vld [vmem:[#allocation21_spill] sm:$0xff] }
 0x20a   : > { %v2943_v24 = vpack.c.bf16 %v2164_v0, %v2163_v42  ;;  %v4828_v42 = vld [vmem:[#allocation22_spill] sm:$0xff]  ;;  %v4829_v0 = vld [vmem:[#allocation23_spill] sm:$0xff] }
 0x20b   : > { %2940 = vmatprep.subr.bf16.mxu0 %v2939_v50 }
 0x20c   : > { %2938 = vmatpush3.bf16.msra.mxu1 %v2937_v44  ;;  %2942 = vmatpush3.bf16.msra.mxu0 %v2939_v50 }
 0x20d   : > { %2944 = vmatprep.subr.bf16.mxu0 %v2943_v24 }
 0x210   : > { %2946 = vmatpush3.bf16.msra.mxu0 %v2943_v24 }
 0x211   : > { %2948 = vmatprep.subr.bf16.mxu0 %v2947_v31 }
 0x214   : > { %2950 = vmatpush3.bf16.msra.mxu0 %v2947_v31  ;;  %v4831_v31 = vld [vmem:[#allocation25_spill] sm:$0xff] }
 0x215   : > { %2952 = vmatprep.subr.bf16.mxu0 %v2951_v60 }
 0x218   : > { %2954 = vmatpush3.bf16.msra.mxu0 %v2951_v60 }
 0x219   : > { %2956 = vmatprep.subr.bf16.mxu0 %v2955_v11 }
 0x21c   : > { %2958 = vmatpush3.bf16.msra.mxu0 %v2955_v11 }
 0x21d   : > { %2960 = vmatprep.subr.bf16.mxu0 %v2959_v49 }
 0x220   : > { %2962 = vmatpush3.bf16.msra.mxu0 %v2959_v49  ;;  %v4838_v49 = vld [vmem:[#allocation32_spill] sm:$0xff] }
 0x221   : > { %2964 = vmatprep.subr.bf16.mxu0 %v2963_v53 }
 0x224   : > { %2966 = vmatpush3.bf16.msra.mxu0 %v2963_v53 }
 0x225   : > { %2968 = vmatprep.subr.bf16.mxu0 %v2967_v30 }
 0x228   : > { %2970 = vmatpush3.bf16.msra.mxu0 %v2967_v30 }
 0x2da   : > { %v2043_v5 = vpop.f32.mrb[32].mxu1 }
 0x2db   : > { %v2044_v35 = vadd.f32 %v2043_v5, %v1932_v56  ;;  %v2809_v55 = vpop.f32.mrb[33].mxu1  ;;  %v4833_v56 = vld [vmem:[#allocation27_spill] sm:$0xff] }
 0x2dd   : > { %v2047_v1 = vmax.f32 %v2044_v35, 0.0  ;;  %v4834_v35 = vld [vmem:[#allocation28_spill] sm:$0xff] }
 0x2df   : > { %2819 = vmatmul.mubr.msk.f32.vlgmr.msra.gmra.mrb[34].mxu1 %vm448_vm0, %v2047_v1  ;;  %v4835_v1 = vld [vmem:[#allocation29_spill] sm:$0xff] }
 0x3b2   : > { %v2117_v63 = vpop.f32.mrb[34].mxu1 }
 0x3b3   : > { %v2118_v14 = vadd.f32 %v2117_v63, %v1937_v25  ;;  %v2820_v32 = vpop.f32.mrb[35].mxu1 }
 0x3b5   : > { %v2121_v52 = vadd.f32 3.0, %v2118_v14 }
 0x3b7   : > { %v2122_v47 = vmax.f32 %v2121_v52, 0.0 }
 0x3b9   : > { %v2123_v22 = vmin.f32 %v2122_v47, 6.0  ;;  %v3029_v47 = vld [vmem:[%s3337_s27] sm:$0xff] }
 0x3bb   : > { %v2124_v2 = vmul.f32 0.16666667, %v2123_v22 }
 0x3bd   : > { %v4487_v3 = vrot.slane %v2124_v2, %v4821_v26 }
 0x3bf   : > { %v2129_v19 = vmul.f32 %v4487_v3, %v4822_v15  ;;  %v2130_v6 = vmul.f32 %v4487_v3, %v4823_v28  ;;  %v2131_v12 = vmul.f32 %v4487_v3, %v4824_v41  ;;  %v2132_v13 = vmul.f32 %v4487_v3, %v4825_v16 }
 0x3c0   : > { %v2133_v44 = vmul.f32 %v4487_v3, %v4826_v57  ;;  %v2134_v23 = vmul.f32 %v4487_v3, %v4827_v7  ;;  %v2135_v50 = vmul.f32 %v4487_v3, %v4828_v42  ;;  %v2136_v24 = vmul.f32 %v4487_v3, %v4829_v0 }
 0x3c1   : > { %2853 = vmatprep.mubr.f32.mxu0 %v2129_v19  ;;  %v2137_v9 = vmul.f32 %v4487_v3, %v4830_v29  ;;  %v2138_v8 = vmul.f32 %v4487_v3, %v4831_v31  ;;  %v2139_v60 = vmul.f32 %v4487_v3, %v4832_v38  ;;  %v2140_v5 = vmul.f32 %v4487_v3, %v4833_v56  ;;  %v3031_v19 = vld [vmem:[%s3337_s27 + $0x10] sm:$0xff] }
 0x3c2   : > { %2854 = vmatmul.mubr.f32.vlgmr.msra.gmra.mrb[0].mxu0 %v2130_v6  ;;  %v2141_v55 = vmul.f32 %v4487_v3, %v4834_v35  ;;  %v2142_v58 = vmul.f32 %v4487_v3, %v4835_v1  ;;  %v2143_v11 = vmul.f32 %v4487_v3, %v4836_v43  ;;  %v2144_v17 = vmul.f32 %v4487_v3, %v4837_v36 }
 0x3c3   : > { %2856 = vmatprep.mubr.f32.mxu0 %v2131_v12  ;;  %v2145_v33 = vmul.f32 %v4487_v3, %v4838_v49  ;;  %v2146_v53 = vmul.f32 %v4487_v3, %v4839_v51  ;;  %v2147_v10 = vmul.f32 %v4487_v3, %v4142_v40  ;;  %v2148_v48 = vmul.f32 %v4487_v3, %v4343_v21 }
 0x3c4   : > { %v2149_v30 = vmul.f32 %v4487_v3, %v4338_v46  ;;  %v2150_v25 = vmul.f32 %v4487_v3, %v4355_v45  ;;  %v2151_v63 = vmul.f32 %v4487_v3, %v4358_v18  ;;  %v2152_v40 = vmul.f32 %v4487_v3, %v4372_v37 }
 0x3c5   : > { %v2153_v14 = vmul.f32 %v4487_v3, %v4375_v4  ;;  %v2154_v46 = vmul.f32 %v4487_v3, %v4385_v34  ;;  %v2155_v21 = vmul.f32 %v4487_v3, %v4388_v61  ;;  %v2156_v45 = vmul.f32 %v4487_v3, %v4395_v20  ;;  %v4556_v61 = vld [vmem:[%s4751_s10] ss:$0 sm:$0xff] }
 0x3c6   : > { %2857 = vmatmul.mubr.f32.gmra.mrb[2].mxu0 %v2132_v13  ;;  %v2157_v18 = vmul.f32 %v4487_v3, %v4398_v27  ;;  %v2158_v37 = vmul.f32 %v4487_v3, %v4403_v54  ;;  %v2159_v4 = vmul.f32 %v4487_v3, %v4406_v59  ;;  %v2160_v34 = vmul.f32 %v4487_v3, %v4411_v62  ;;  %v3028_v59 = vld [vmem:[%s3337_s27 + $0x8] sm:$0xff]  ;;  %v3030_v3 = vld [vmem:[%s3337_s27 + $0x18] sm:$0xff] }
 0x3c7   : > { %2859 = vmatprep.mubr.f32.mxu0 %v2133_v44  ;;  %v3032_v13 = vld [vmem:[%s3337_s27 + $0x28] sm:$0xff]  ;;  %v3033_v44 = vld [vmem:[%s3337_s27 + $0x20] sm:$0xff] }
 0x3ca   : > { %2860 = vmatmul.mubr.f32.gmra.mrb[4].mxu0 %v2134_v23 }
 0x3cb   : > { %2862 = vmatprep.mubr.f32.mxu0 %v2135_v50 }
 0x3ce   : > { %2863 = vmatmul.mubr.f32.gmra.mrb[6].mxu0 %v2136_v24  ;;  %v3034_v24 = vld [vmem:[%s3337_s27 + $0x38] sm:$0xff] }
 0x3cf   : > { %2865 = vmatprep.mubr.f32.mxu0 %v2137_v9  ;;  %v3035_v9 = vld [vmem:[%s3337_s27 + $0x30] sm:$0xff] }
 0x3d2   : > { %2866 = vmatmul.mubr.f32.gmra.mrb[8].mxu0 %v2138_v8 }
 0x3d3   : > { %2868 = vmatprep.mubr.f32.mxu0 %v2139_v60 }
 0x3d6   : > { %2869 = vmatmul.mubr.f32.gmra.mrb[10].mxu0 %v2140_v5  ;;  %v3036_v5 = vld [vmem:[%s3337_s27 + $0x48] sm:$0xff] }
 0x3d7   : > { %2871 = vmatprep.mubr.f32.mxu0 %v2141_v55  ;;  %v3037_v55 = vld [vmem:[%s3337_s27 + $0x40] sm:$0xff] }
 0x3da   : > { %2872 = vmatmul.mubr.f32.gmra.mrb[12].mxu0 %v2142_v58 }
 0x3db   : > { %2874 = vmatprep.mubr.f32.mxu0 %v2143_v11 }
 0x3de   : > { %2875 = vmatmul.mubr.f32.gmra.mrb[14].mxu0 %v2144_v17  ;;  %v3038_v17 = vld [vmem:[%s3337_s27 + $0x58] sm:$0xff] }
 0x3df   : > { %2877 = vmatprep.mubr.f32.mxu0 %v2145_v33  ;;  %v3039_v33 = vld [vmem:[%s3337_s27 + $0x50] sm:$0xff] }
 0x3e2   : > { %2878 = vmatmul.mubr.f32.gmra.mrb[16].mxu0 %v2146_v53 }
 0x3e3   : > { %2880 = vmatprep.mubr.f32.mxu0 %v2147_v10 }
 0x3e6   : > { %2881 = vmatmul.mubr.f32.gmra.mrb[18].mxu0 %v2148_v48 }
 0x3e7   : > { %2883 = vmatprep.mubr.f32.mxu0 %v2149_v30 }
 0x3ea   : > { %2884 = vmatmul.mubr.f32.gmra.mrb[20].mxu0 %v2150_v25  ;;  %v3040_v25 = vld [vmem:[%s3337_s27 + $0x68] sm:$0xff] }
 0x3eb   : > { %2886 = vmatprep.mubr.f32.mxu0 %v2151_v63 }
 0x3ee   : > { %2887 = vmatmul.mubr.f32.gmra.mrb[22].mxu0 %v2152_v40  ;;  %v3041_v40 = vld [vmem:[%s3337_s27 + $0x60] sm:$0xff] }
 0x3ef   : > { %2889 = vmatprep.mubr.f32.mxu0 %v2153_v14 }
 0x3f2   : > { %2890 = vmatmul.mubr.f32.gmra.mrb[24].mxu0 %v2154_v46 }
 0x3f3   : > { %2892 = vmatprep.mubr.f32.mxu0 %v2155_v21 }
 0x3f6   : > { %2893 = vmatmul.mubr.f32.gmra.mrb[26].mxu0 %v2156_v45 }
 0x3f7   : > { %2895 = vmatprep.mubr.f32.mxu0 %v2157_v18 }
 0x3fa   : > { %2896 = vmatmul.mubr.f32.gmra.mrb[28].mxu0 %v2158_v37  ;;  %v3042_v37 = vld [vmem:[%s3337_s27 + $0x78] sm:$0xff] }
 0x3fb   : > { %2898 = vmatprep.mubr.f32.mxu0 %v2159_v4 }
 0x3fe   : > { %2899 = vmatmul.mubr.f32.gmra.mrb[30].mxu0 %v2160_v34  ;;  %v3043_v34 = vld [vmem:[%s3337_s27 + $0x70] sm:$0xff] }
 0x495   : > { %v2855_v20 = vpop.f32.mrb[0].mxu0 }
 0x496   : > { %v2256_v27 = vadd.f32 %v2855_v20, %v4556_v61  ;;  %v2250_v54 = vpop.f32.mrb[1].mxu0 }
 0x497   : > { %v2251_v32 = vadd.f32 %v4556_v61, %v2250_v54 }
 0x498   : > { %v2410_v52 = vadd.f32 %v3028_v59, %v2256_v27 }
 0x499   : > { %v2409_v22 = vadd.f32 %v3029_v47, %v2251_v32  ;;  %v2858_v2 = vpop.f32.mrb[2].mxu0 }
 0x49a   : > { %2442 = vst.msk [vmem:[%s4564_s14 + $0x8] sm:$0xff] %vm448_vm0, %v2410_v52  ;;  %v2266_v62 = vadd.f32 %v2858_v2, %v4556_v61  ;;  %v2260_v39 = vpop.f32.mrb[3].mxu0  ;;  %v3044_v52 = vld [vmem:[%s3337_s27 + $0x88] sm:$0xff] }
 0x49b   : > { %2441 = vst.msk [vmem:[%s4564_s14] sm:$0xff] %vm448_vm0, %v2409_v22  ;;  %v2261_v26 = vadd.f32 %v4556_v61, %v2260_v39  ;;  %v3045_v22 = vld [vmem:[%s3337_s27 + $0x80] sm:$0xff] }
 0x49c   : > { %v2412_v15 = vadd.f32 %v3030_v3, %v2266_v62 }
 0x49d   : > { %v2411_v28 = vadd.f32 %v3031_v19, %v2261_v26  ;;  %v2861_v6 = vpop.f32.mrb[4].mxu0 }
 0x49e   : > { %2444 = vst.msk [vmem:[%s4564_s14 + $0x18] sm:$0xff] %vm448_vm0, %v2412_v15  ;;  %v2276_v41 = vadd.f32 %v2861_v6, %v4556_v61  ;;  %v2270_v12 = vpop.f32.mrb[5].mxu0  ;;  %v3046_v15 = vld [vmem:[%s3337_s27 + $0x98] sm:$0xff] }
 0x49f   : > { %2443 = vst.msk [vmem:[%s4564_s14 + $0x10] sm:$0xff] %vm448_vm0, %v2411_v28  ;;  %v2271_v16 = vadd.f32 %v4556_v61, %v2270_v12  ;;  %v3047_v28 = vld [vmem:[%s3337_s27 + $0x90] sm:$0xff] }
 0x4a0   : > { %v2414_v57 = vadd.f32 %v3032_v13, %v2276_v41 }
 0x4a1   : > { %v2413_v7 = vadd.f32 %v3033_v44, %v2271_v16  ;;  %v2864_v23 = vpop.f32.mrb[6].mxu0 }
 0x4a2   : > { %2446 = vst.msk [vmem:[%s4564_s14 + $0x28] sm:$0xff] %vm448_vm0, %v2414_v57  ;;  %v2286_v42 = vadd.f32 %v2864_v23, %v4556_v61  ;;  %v2280_v50 = vpop.f32.mrb[7].mxu0  ;;  %v3048_v57 = vld [vmem:[%s3337_s27 + $0xa8] sm:$0xff] }
 0x4a3   : > { %2445 = vst.msk [vmem:[%s4564_s14 + $0x20] sm:$0xff] %vm448_vm0, %v2413_v7  ;;  %v2281_v0 = vadd.f32 %v4556_v61, %v2280_v50  ;;  %v3049_v7 = vld [vmem:[%s3337_s27 + $0xa0] sm:$0xff] }
 0x4a4   : > { %v2416_v29 = vadd.f32 %v3034_v24, %v2286_v42 }
 0x4a5   : > { %v2415_v31 = vadd.f32 %v3035_v9, %v2281_v0  ;;  %v2867_v8 = vpop.f32.mrb[8].mxu0 }
 0x4a6   : > { %2448 = vst.msk [vmem:[%s4564_s14 + $0x38] sm:$0xff] %vm448_vm0, %v2416_v29  ;;  %v2296_v38 = vadd.f32 %v2867_v8, %v4556_v61  ;;  %v2290_v60 = vpop.f32.mrb[9].mxu0  ;;  %v3050_v29 = vld [vmem:[%s3337_s27 + $0xb8] sm:$0xff] }
 0x4a7   : > { %2447 = vst.msk [vmem:[%s4564_s14 + $0x30] sm:$0xff] %vm448_vm0, %v2415_v31  ;;  %v2291_v56 = vadd.f32 %v4556_v61, %v2290_v60  ;;  %v3051_v31 = vld [vmem:[%s3337_s27 + $0xb0] sm:$0xff] }
 0x4a8   : > { %v2418_v35 = vadd.f32 %v3036_v5, %v2296_v38 }
 0x4a9   : > { %v2417_v1 = vadd.f32 %v3037_v55, %v2291_v56  ;;  %v2870_v58 = vpop.f32.mrb[10].mxu0 }
 0x4aa   : > { %2450 = vst.msk [vmem:[%s4564_s14 + $0x48] sm:$0xff] %vm448_vm0, %v2418_v35  ;;  %v2306_v43 = vadd.f32 %v2870_v58, %v4556_v61  ;;  %v2300_v11 = vpop.f32.mrb[11].mxu0  ;;  %v3052_v35 = vld [vmem:[%s3337_s27 + $0xc8] sm:$0xff] }
 0x4ab   : > { %2449 = vst.msk [vmem:[%s4564_s14 + $0x40] sm:$0xff] %vm448_vm0, %v2417_v1  ;;  %v2301_v36 = vadd.f32 %v4556_v61, %v2300_v11  ;;  %v3053_v1 = vld [vmem:[%s3337_s27 + $0xc0] sm:$0xff] }
 0x4ac   : > { %v2420_v49 = vadd.f32 %v3038_v17, %v2306_v43 }
 0x4ad   : > { %v2419_v51 = vadd.f32 %v3039_v33, %v2301_v36  ;;  %v2873_v53 = vpop.f32.mrb[12].mxu0 }
 0x4ae   : > { %2452 = vst.msk [vmem:[%s4564_s14 + $0x58] sm:$0xff] %vm448_vm0, %v2420_v49  ;;  %v2316_v10 = vadd.f32 %v2873_v53, %v4556_v61  ;;  %v2310_v48 = vpop.f32.mrb[13].mxu0  ;;  %v3054_v49 = vld [vmem:[%s3337_s27 + $0xd8] sm:$0xff] }
 0x4af   : > { %2451 = vst.msk [vmem:[%s4564_s14 + $0x50] sm:$0xff] %vm448_vm0, %v2419_v51  ;;  %v2311_v30 = vadd.f32 %v4556_v61, %v2310_v48  ;;  %v3055_v51 = vld [vmem:[%s3337_s27 + $0xd0] sm:$0xff] }
 0x4b0   : > { %v2422_v63 = vadd.f32 %v3040_v25, %v2316_v10 }
 0x4b1   : > { %v2421_v14 = vadd.f32 %v3041_v40, %v2311_v30  ;;  %v2876_v46 = vpop.f32.mrb[14].mxu0 }
 0x4b2   : > { %2454 = vst.msk [vmem:[%s4564_s14 + $0x68] sm:$0xff] %vm448_vm0, %v2422_v63  ;;  %v2326_v21 = vadd.f32 %v2876_v46, %v4556_v61  ;;  %v2320_v45 = vpop.f32.mrb[15].mxu0  ;;  %v3056_v63 = vld [vmem:[%s3337_s27 + $0xe8] sm:$0xff] }
 0x4b3   : > { %2453 = vst.msk [vmem:[%s4564_s14 + $0x60] sm:$0xff] %vm448_vm0, %v2421_v14  ;;  %v2321_v18 = vadd.f32 %v4556_v61, %v2320_v45  ;;  %v3057_v14 = vld [vmem:[%s3337_s27 + $0xe0] sm:$0xff] }
 0x4b4   : > { %v2424_v4 = vadd.f32 %v3042_v37, %v2326_v21 }
 0x4b5   : > { %v2423_v20 = vadd.f32 %v3043_v34, %v2321_v18  ;;  %v2879_v27 = vpop.f32.mrb[16].mxu0 }
 0x4b6   : > { %2456 = vst.msk [vmem:[%s4564_s14 + $0x78] sm:$0xff] %vm448_vm0, %v2424_v4  ;;  %v2336_v54 = vadd.f32 %v2879_v27, %v4556_v61  ;;  %v2330_v32 = vpop.f32.mrb[17].mxu0  ;;  %v3058_v4 = vld [vmem:[%s3337_s27 + $0xf8] sm:$0xff] }
 0x4b7   : > { %2455 = vst.msk [vmem:[%s4564_s14 + $0x70] sm:$0xff] %vm448_vm0, %v2423_v20  ;;  %v2331_v59 = vadd.f32 %v4556_v61, %v2330_v32  ;;  %v3059_v20 = vld [vmem:[%s3337_s27 + $0xf0] sm:$0xff] }
 0x4b8   : > { %v2426_v47 = vadd.f32 %v3044_v52, %v2336_v54 }
 0x4b9   : > { %v2425_v2 = vadd.f32 %v3045_v22, %v2331_v59  ;;  %v2882_v62 = vpop.f32.mrb[18].mxu0 }
 0x4ba   : > { %2458 = vst.msk [vmem:[%s4564_s14 + $0x88] sm:$0xff] %vm448_vm0, %v2426_v47  ;;  %v2346_v39 = vadd.f32 %v2882_v62, %v4556_v61  ;;  %v2340_v26 = vpop.f32.mrb[19].mxu0 }
 0x4bb   : > { %2457 = vst.msk [vmem:[%s4564_s14 + $0x80] sm:$0xff] %vm448_vm0, %v2425_v2  ;;  %v2341_v3 = vadd.f32 %v4556_v61, %v2340_v26 }
 0x4bc   : > { %v2428_v19 = vadd.f32 %v3046_v15, %v2346_v39 }
 0x4bd   : > { %v2427_v6 = vadd.f32 %v3047_v28, %v2341_v3  ;;  %v2885_v41 = vpop.f32.mrb[20].mxu0 }
 0x4be   : > { %2460 = vst.msk [vmem:[%s4564_s14 + $0x98] sm:$0xff] %vm448_vm0, %v2428_v19  ;;  %v2356_v12 = vadd.f32 %v2885_v41, %v4556_v61  ;;  %v2350_v16 = vpop.f32.mrb[21].mxu0 }
 0x4bf   : > { %2459 = vst.msk [vmem:[%s4564_s14 + $0x90] sm:$0xff] %vm448_vm0, %v2427_v6  ;;  %v2351_v13 = vadd.f32 %v4556_v61, %v2350_v16 }
 0x4c0   : > { %v2430_v44 = vadd.f32 %v3048_v57, %v2356_v12 }
 0x4c1   : > { %v2429_v23 = vadd.f32 %v3049_v7, %v2351_v13  ;;  %v2888_v42 = vpop.f32.mrb[22].mxu0 }
 0x4c2   : > { %2462 = vst.msk [vmem:[%s4564_s14 + $0xa8] sm:$0xff] %vm448_vm0, %v2430_v44  ;;  %v2366_v50 = vadd.f32 %v2888_v42, %v4556_v61  ;;  %v2360_v0 = vpop.f32.mrb[23].mxu0 }
 0x4c3   : > { %2461 = vst.msk [vmem:[%s4564_s14 + $0xa0] sm:$0xff] %vm448_vm0, %v2429_v23  ;;  %v2361_v24 = vadd.f32 %v4556_v61, %v2360_v0 }
 0x4c4   : > { %v2432_v9 = vadd.f32 %v3050_v29, %v2366_v50 }
 0x4c5   : > { %v2431_v8 = vadd.f32 %v3051_v31, %v2361_v24  ;;  %v2891_v38 = vpop.f32.mrb[24].mxu0 }
 0x4c6   : > { %2464 = vst.msk [vmem:[%s4564_s14 + $0xb8] sm:$0xff] %vm448_vm0, %v2432_v9  ;;  %v2376_v60 = vadd.f32 %v2891_v38, %v4556_v61  ;;  %v2370_v56 = vpop.f32.mrb[25].mxu0 }
 0x4c7   : > { %2463 = vst.msk [vmem:[%s4564_s14 + $0xb0] sm:$0xff] %vm448_vm0, %v2431_v8  ;;  %v2371_v5 = vadd.f32 %v4556_v61, %v2370_v56 }
 0x4c8   : > { %v2434_v55 = vadd.f32 %v3052_v35, %v2376_v60 }
 0x4c9   : > { %v2433_v58 = vadd.f32 %v3053_v1, %v2371_v5  ;;  %v2894_v43 = vpop.f32.mrb[26].mxu0 }
 0x4ca   : > { %2466 = vst.msk [vmem:[%s4564_s14 + $0xc8] sm:$0xff] %vm448_vm0, %v2434_v55  ;;  %v2386_v11 = vadd.f32 %v2894_v43, %v4556_v61  ;;  %v2380_v36 = vpop.f32.mrb[27].mxu0 }
 0x4cb   : > { %2465 = vst.msk [vmem:[%s4564_s14 + $0xc0] sm:$0xff] %vm448_vm0, %v2433_v58  ;;  %v2381_v17 = vadd.f32 %v4556_v61, %v2380_v36 }
 0x4cc   : > { %v2436_v33 = vadd.f32 %v3054_v49, %v2386_v11 }
 0x4cd   : > { %v2435_v53 = vadd.f32 %v3055_v51, %v2381_v17  ;;  %v2897_v10 = vpop.f32.mrb[28].mxu0 }
 0x4ce   : > { %2468 = vst.msk [vmem:[%s4564_s14 + $0xd8] sm:$0xff] %vm448_vm0, %v2436_v33  ;;  %v2396_v48 = vadd.f32 %v2897_v10, %v4556_v61  ;;  %v2390_v30 = vpop.f32.mrb[29].mxu0 }
 0x4cf   : > { %2467 = vst.msk [vmem:[%s4564_s14 + $0xd0] sm:$0xff] %vm448_vm0, %v2435_v53  ;;  %v2391_v25 = vadd.f32 %v4556_v61, %v2390_v30 }
 0x4d0   : > { %v2438_v40 = vadd.f32 %v3056_v63, %v2396_v48 }
 0x4d1   : > { %v2437_v46 = vadd.f32 %v3057_v14, %v2391_v25  ;;  %v2900_v21 = vpop.f32.mrb[30].mxu0 }
 0x4d2   : > { %2470 = vst.msk [vmem:[%s4564_s14 + $0xe8] sm:$0xff] %vm448_vm0, %v2438_v40  ;;  %v2406_v45 = vadd.f32 %v2900_v21, %v4556_v61  ;;  %v2400_v18 = vpop.f32.mrb[31].mxu0 }
 0x4d3   : > { %2469 = vst.msk [vmem:[%s4564_s14 + $0xe0] sm:$0xff] %vm448_vm0, %v2437_v46  ;;  %v2401_v37 = vadd.f32 %v4556_v61, %v2400_v18 }
 0x4d4   : > { %v2440_v34 = vadd.f32 %v3058_v4, %v2406_v45 }
 0x4d5   : > { %v2439_v27 = vadd.f32 %v3059_v20, %v2401_v37 }
 0x4d6   : > { %2472 = vst.msk [vmem:[%s4564_s14 + $0xf8] sm:$0xff] %vm448_vm0, %v2440_v34 }
 0x4d7   : > { %2471 = vst.msk [vmem:[%s4564_s14 + $0xf0] sm:$0xff] %vm448_vm0, %v2439_v27 }
 0x4d8   : > { %3103 = shalt.err (!%p3100_p2)
}
 0x4d9   : > { %s3104_s27 = scalar_lea.hbm %s4690_s24, 4096  ;;  %s3108_s12 = scalar_lea.hbm %s4752_s11, 8192 }
 0x4da   : > { %p3105_p4 = scmp.ne.s32.totalorder %s4690_s24, %s3104_s27  ;;  %p3109_p9 = scmp.lt.u32.totalorder %s4690_s24, %s4752_s11 }
 0x4db   : > { %p3110_p1 = scmp.lt.u32.totalorder %s3108_s12, %s3104_s27  ;;  %p3112_p6 = scmp.lt.u32.totalorder %s3104_s27, %s4690_s24 }
 0x4dc   : > { %p3106_p5 = pnand %p3105_p4, %p4841_p11 }
 0x4dd   : > { %p3111_p3 = por %p3110_p1, %p3109_p9 }
 0x4de   : > { %p3107_p7 = pneg %p3106_p5 }
 0x4df   : > { %p3113_p12 = por %p3112_p6, %p3111_p3 }
 0x4e1   : > { %p3114_p13 = pnand %p3113_p12, %p3107_p7 }
 0x4e3   : > { %3117 = shalt.err (!%p3114_p13)
}
 0x4e4   : > { %s3165_s25 = smov 128   ;;  %s3166_s15 = smov 8  }
 0x4e5   : > { %2973 = dma.vmem_to_hbm [thread:$0]  (%p4841_p11), %s4692_s19, 4096, %s4690_s24, %s2474_s21, %s3165_s25, %s3165_s25, %s3166_s15  }
 0x4e6 PF: > { %s2502_s28 = sand.u32 1, %s3144_s17   ;;  %p4842_p8 = scmp.ne.s32.totalorder %s4786_s30, 0 }
 0x4e7   : > { %p4843_p10 = scmp.ge.s32.totalorder %s3156_s20, 2  ;;  %s2503_s27 = scalar_lea.sflag [#allocation5], %s2502_s28 }
 0x4e9   : > { %p2980_p0 = pnand %p4843_p10, %p4842_p8 }
 0x4eb   : > { %3139 = dma.done.wait (!%p2980_p0), %s2503_s27, 4096  }
 0x4ec   : > { %3141 = vsyncadd (!%p2980_p0), %s2503_s27, 4294963200  ;;  %s4844_s14 = sld [smem:[#allocation9_spill]]  ;;  %s4845_s19 = sld [smem:[#allocation10_spill]] }
 0x4ed   : > { %p24_p2 = scmp.ge.s32.totalorder %s3252_s23, 4   ;;  %s4846_s17 = smov %s3148_s18 }
 0x4ee   : > { %s4848_s20 = smov %s3252_s23 }
 0x4ef   :  { %26 = sbr.rel (!%p24_p2) target bundleno = 5 (0x5), region = 112 }
 0x4f2   : > { %s4847_s18 = smov %s4844_s14 }
 0x4f6   :  { %2508 = vsyncpa [#allocation4], 1 }
 0x4f7   :  { %2510 = vsyncpa [#allocation4 + $0x1], 1 }
 0x4f8   :  { %2511 = vsyncpa [#allocation5], 1 }
 0x4f9   :  { %2513 = vsyncpa [#allocation5 + $0x1], 1 }

</bundles_post_ra>
